<compile_context>
chip_gen: v7x
topology: tpu7x:2x2x1
jax: 0.10.0
libtpu: 0.0.40
codegen_flags: <defaults>
</compile_context>

<pallas_src>
import jax
import jax.numpy as jnp
from jax import lax
from jax.experimental import pallas as pl
from jax.experimental.pallas import tpu as pltpu


def _lstm_linear_kernel(x_ref, wih0_ref, whh0_ref, b0_ref,
                        wih1_ref, whh1_ref, b1_ref,
                        wl_ref, bl_ref, out_ref,
                        g0_scr, h0_scr, c0_scr, h1_scr, c1_scr):
    """One (batch block, time chunk) step of the 2-layer LSTM (+ final Linear).

    Gate columns are pre-permuted to [i | f | o | g].  The recurrent state
    (h0, c0, h1, c1) persists across time chunks in VMEM scratch.
    """
    Sc, BB, I = x_ref.shape
    H = whh0_ref.shape[0]                     # whh0 stored pre-transposed: (H, 4H)
    tc = pl.program_id(1)
    n_tc = pl.num_programs(1)

    # ---- (Re)initialize the recurrent state at the first chunk of a block ----
    @pl.when(tc == 0)
    def _():
        h0_scr[...] = jnp.zeros_like(h0_scr)
        c0_scr[...] = jnp.zeros_like(c0_scr)
        h1_scr[...] = jnp.zeros_like(h1_scr)
        c1_scr[...] = jnp.zeros_like(c1_scr)

    # ---- Hoisted layer-0 input projection for this chunk (one bf16 MXU call) ----
    # TODO(synk): feed x as bf16 from HBM (halves x DMA/VMEM) once the bf16
    # sub-tile reshape is validated on the target toolchain; kept f32 at the
    # boundary here and cast before the dot for a guaranteed-clean compile.
    x_all = x_ref[...].reshape(Sc * BB, I).astype(jnp.bfloat16)
    g0_scr[...] = (
        jnp.dot(x_all, wih0_ref[...], preferred_element_type=jnp.float32)
        + b0_ref[...]
    ).reshape(Sc, BB, 4 * H)

    # Hoist weights out of the recurrence (avoid per-iteration reloads).
    whh0 = whh0_ref[...]                      # (H, 4H)  bf16
    wih1 = wih1_ref[...]                      # (H, 4H)  bf16
    whh1 = whh1_ref[...]                      # (H, 4H)  bf16
    b1 = b1_ref[...]                          # (1, 4H)  f32

    def gates_to_hc(gates, c):
        # Permuted gate order [i | f | o | g]: one wide sigmoid + one tanh.
        s = jax.nn.sigmoid(gates[:, : 3 * H])
        i_g = s[:, 0 * H:1 * H]
        f_g = s[:, 1 * H:2 * H]
        o_g = s[:, 2 * H:3 * H]
        g_g = jnp.tanh(gates[:, 3 * H:])
        c_new = f_g * c + i_g * g_g
        h_new = o_g * jnp.tanh(c_new)
        return h_new, c_new

    def cell0(t, h, c):
        gates = g0_scr[t] + jnp.dot(h.astype(jnp.bfloat16), whh0,
                                    preferred_element_type=jnp.float32)
        return gates_to_hc(gates, c)

    def cell1(h_in, h, c):
        gates = (jnp.dot(h_in.astype(jnp.bfloat16), wih1,
                         preferred_element_type=jnp.float32)
                 + jnp.dot(h.astype(jnp.bfloat16), whh1,
                           preferred_element_type=jnp.float32)
                 + b1)
        return gates_to_hc(gates, c)

    h0 = h0_scr[...]
    c0 = c0_scr[...]
    h1 = h1_scr[...]
    c1 = c1_scr[...]
    is_first_chunk = tc == 0

    # ---- Wavefront recurrence: iteration t = layer-0 step t + layer-1 step t-1.
    # Both matmuls only depend on the carry, so they overlap on the MXU instead
    # of forming a 2*S-long serial chain.
    def body(t, carry):
        h0, c0, h1, c1 = carry
        h1n, c1n = cell1(h0, h1, c1)          # layer-1 step (global t-1)
        h0n, c0n = cell0(t, h0, c0)           # layer-0 step (global t)
        # The very first global step has no pending layer-1 step.  h1/c1 are
        # still zero there, so masking the dummy update to zero == keeping them.
        keep = 1.0 - jnp.logical_and(is_first_chunk, t == 0).astype(jnp.float32)
        h1n = h1n * keep
        c1n = c1n * keep
        return h0n, c0n, h1n, c1n

    unroll = True if Sc <= 32 else 4          # full unroll only for short chunks
    h0, c0, h1, c1 = lax.fori_loop(0, Sc, body, (h0, c0, h1, c1), unroll=unroll)

    h0_scr[...] = h0
    c0_scr[...] = c0
    h1_scr[...] = h1
    c1_scr[...] = c1

    # ---- Last chunk: trailing layer-1 step S-1 and the final Linear ----
    @pl.when(tc == n_tc - 1)
    def _():
        h1f, _ = cell1(h0, h1, c1)
        out_ref[...] = (
            jnp.dot(h1f.astype(jnp.bfloat16), wl_ref[...],
                    preferred_element_type=jnp.float32)
            + bl_ref[...]
        )


# ----------------------------------------------------------------------------
# Wrapper / parameter prep
# ----------------------------------------------------------------------------

def _round_up(n, m):
    return ((n + m - 1) // m) * m


def _pick_batch_block(batch, requested):
    bb = max(8, (int(requested) // 8) * 8)
    b8 = _round_up(batch, 8)
    bb = min(bb, b8)
    # v7x has 2 TensorCores: keep >=2 blocks on the "parallel" axis when possible.
    if b8 >= 16 and b8 // bb < 2:
        bb = max(8, _round_up(b8 // 2, 8))
    return bb


def _pick_time_chunk(seq, target):
    if seq <= target:
        return seq
    for c in range(target, 1, -1):
        if seq % c == 0:
            return c
    # TODO(synk): ragged time chunks (pl.BoundedSlice) for prime S; fall back to
    # a fully resident time axis (fine on v5e/v6e for moderate S).
    return seq


def _vmem_limit_bytes():
    # ~3/4 of physical VMEM: ~96 MiB on v5e/v6e (128 MiB), ~48 MiB on v7x (64 MiB),
    # leaving headroom for double-buffered x chunks + compiler scratch.
    try:
        cap = int(pltpu.get_tpu_info().vmem_capacity_bytes)
    except Exception:
        cap = 64 * 1024 * 1024
    return int(max(32 * 1024 * 1024, (cap * 3) // 4))


def _full_spec(shape):
    ndim = len(shape)
    return pl.BlockSpec(shape, lambda b, t, _n=ndim: (0,) * _n)


def prepare_kernel_params(p):
    """PyTorch-layout params -> kernel layout (transposed, gate-permuted, bf16)."""
    H = p["w_hh_l0"].shape[1]
    bf16 = jnp.bfloat16

    def permute_gates(w):
        # last-axis gate blocks: PyTorch [i | f | g | o] -> kernel [i | f | o | g]
        return jnp.concatenate(
            [w[..., : 2 * H], w[..., 3 * H:], w[..., 2 * H: 3 * H]], axis=-1)

    def wt(w):                                 # (4H, in) -> (in, 4H)
        return permute_gates(w.T).astype(bf16)

    def bias(b_ih, b_hh):                      # fold the two bias vectors
        return permute_gates((b_ih + b_hh)[None, :]).astype(jnp.float32)

    return {
        "wih0": wt(p["w_ih_l0"]), "whh0": wt(p["w_hh_l0"]),
        "b0": bias(p["b_ih_l0"], p["b_hh_l0"]),
        "wih1": wt(p["w_ih_l1"]), "whh1": wt(p["w_hh_l1"]),
        "b1": bias(p["b_ih_l1"], p["b_hh_l1"]),
        "wl": p["w_lin"].T.astype(bf16),
        "bl": p["b_lin"][None, :].astype(jnp.float32),
    }


def rnn_lstm_model_pallas(x, torch_params, *, batch_block=128, time_chunk=32):
    """x: (batch, seq, input_size) float32, batch_first like the PyTorch module."""
    B, S, I = x.shape
    H = torch_params["w_hh_l0"].shape[1]
    O = torch_params["w_lin"].shape[0]
    kp = prepare_kernel_params(torch_params)

    BB = _pick_batch_block(B, batch_block)
    Bp = _round_up(B, BB)
    Sc = _pick_time_chunk(S, time_chunk)

    # Time-major keeps the per-step staged-gate reads contiguous in VMEM.
    # TODO(synk): evaluate blocking x batch-major (BB, S, I) straight from HBM
    # (skips this extra HBM pass) vs. the strided per-step gate reads it implies.
    x_tm = jnp.transpose(x, (1, 0, 2)).astype(jnp.float32)       # (S, B, I)
    if Bp != B:
        x_tm = jnp.pad(x_tm, ((0, 0), (0, Bp - B), (0, 0)))

    grid = (Bp // BB, S // Sc)

    in_specs = [
        pl.BlockSpec((Sc, BB, I), lambda b, t: (t, b, 0)),       # x: time-chunked
        _full_spec(kp["wih0"].shape), _full_spec(kp["whh0"].shape),
        _full_spec(kp["b0"].shape),
        _full_spec(kp["wih1"].shape), _full_spec(kp["whh1"].shape),
        _full_spec(kp["b1"].shape),
        _full_spec(kp["wl"].shape), _full_spec(kp["bl"].shape),
    ]
    out_spec = pl.BlockSpec((BB, O), lambda b, t: (b, 0))

    out_padded = pl.pallas_call(
        _lstm_linear_kernel,
        out_shape=jax.ShapeDtypeStruct((Bp, O), jnp.float32),
        grid=grid,
        in_specs=in_specs,
        out_specs=out_spec,
        scratch_shapes=[
            pltpu.VMEM((Sc, BB, 4 * H), jnp.float32),   # staged layer-0 pre-gates
            pltpu.VMEM((BB, H), jnp.float32),            # h0 carry (across chunks)
            pltpu.VMEM((BB, H), jnp.float32),            # c0 carry
            pltpu.VMEM((BB, H), jnp.float32),            # h1 carry
            pltpu.VMEM((BB, H), jnp.float32),            # c1 carry
        ],
        compiler_params=pltpu.CompilerParams(
            dimension_semantics=("parallel", "arbitrary"),
            vmem_limit_bytes=_vmem_limit_bytes(),
        ),
    )(x_tm,
      kp["wih0"], kp["whh0"], kp["b0"],
      kp["wih1"], kp["whh1"], kp["b1"],
      kp["wl"], kp["bl"])

    return out_padded[:B]


# ----------------------------------------------------------------------------
# Deterministic init (PyTorch layout) + pure-JAX reference
# ----------------------------------------------------------------------------

def init_params(key, input_size, hidden_size, output_size):
    """PyTorch-layout parameters, U(-1/sqrt(H), 1/sqrt(H)) like nn.LSTM/nn.Linear."""
    H, I, O = hidden_size, input_size, output_size
    k = 1.0 / jnp.sqrt(jnp.float32(H))
    keys = jax.random.split(key, 10)

    def u(kk, shape):
        return jax.random.uniform(kk, shape, jnp.float32, minval=-k, maxval=k)

    return {
        "w_ih_l0": u(keys[0], (4 * H, I)), "w_hh_l0": u(keys[1], (4 * H, H)),
        "b_ih_l0": u(keys[2], (4 * H,)),   "b_hh_l0": u(keys[3], (4 * H,)),
        "w_ih_l1": u(keys[4], (4 * H, H)), "w_hh_l1": u(keys[5], (4 * H, H)),
        "b_ih_l1": u(keys[6], (4 * H,)),   "b_hh_l1": u(keys[7], (4 * H,)),
        "w_lin":   u(keys[8], (O, H)),     "b_lin":   u(keys[9], (O,)),
    }


def rnn_lstm_model_ref(x, p):
    """Pure-JAX f32 reference with PyTorch LSTM semantics (gate order i,f,g,o)."""
    B, S, I = x.shape
    H = p["w_hh_l0"].shape[1]

    def cell(xt, h, c, w_ih, w_hh, b_ih, b_hh):
        g = xt @ w_ih.T + h @ w_hh.T + b_ih + b_hh
        i = jax.nn.sigmoid(g[:, :H])
        f = jax.nn.sigmoid(g[:, H:2 * H])
        gg = jnp.tanh(g[:, 2 * H:3 * H])
        o = jax.nn.sigmoid(g[:, 3 * H:])
        c = f * c + i * gg
        return o * jnp.tanh(c), c

    h0 = c0 = h1 = c1 = jnp.zeros((B, H), jnp.float32)
    for t in range(S):
        h0, c0 = cell(x[:, t, :], h0, c0,
                      p["w_ih_l0"], p["w_hh_l0"], p["b_ih_l0"], p["b_hh_l0"])
        h1, c1 = cell(h0, h1, c1,
                      p["w_ih_l1"], p["w_hh_l1"], p["b_ih_l1"], p["b_hh_l1"])
    return h1 @ p["w_lin"].T + p["b_lin"]


if __name__ == "__main__":
    batch, seq, input_size, hidden_size, output_size = 2, 8, 16, 32, 8

    key = jax.random.PRNGKey(0)
    k_x, k_p = jax.random.split(key)
    x = jax.random.normal(k_x, (batch, seq, input_size), jnp.float32)
    params = init_params(k_p, input_size, hidden_size, output_size)

    out = rnn_lstm_model_pallas(x, params)
    out = jax.block_until_ready(out)

    ref = rnn_lstm_model_ref(x, params)
    assert out.shape == (batch, output_size)
    # bf16 MXU operands (f32 accumulation / f32 cell state) => loosened tolerance.
    assert jnp.allclose(out, ref, atol=3e-2, rtol=3e-2), \
        float(jnp.max(jnp.abs(out - ref)))

    print("KERNEL_OK")
</pallas_src>

<mosaic_0001>
module attributes {stable_mosaic.version = 11 : i64} {
  func.func @_lstm_linear_kernel(%arg0: i32, %arg1: i32, %arg2: memref<8x8x16xf32, #tpu.memory_space<vmem>>, %arg3: memref<16x128xbf16, #tpu.memory_space<vmem>>, %arg4: memref<32x128xbf16, #tpu.memory_space<vmem>>, %arg5: memref<1x128xf32, #tpu.memory_space<vmem>>, %arg6: memref<32x128xbf16, #tpu.memory_space<vmem>>, %arg7: memref<32x128xbf16, #tpu.memory_space<vmem>>, %arg8: memref<1x128xf32, #tpu.memory_space<vmem>>, %arg9: memref<32x8xbf16, #tpu.memory_space<vmem>>, %arg10: memref<1x8xf32, #tpu.memory_space<vmem>>, %arg11: memref<8x8xf32, #tpu.memory_space<vmem>>, %arg12: memref<8x8x128xf32, #tpu.memory_space<vmem>>, %arg13: memref<8x32xf32, #tpu.memory_space<vmem>>, %arg14: memref<8x32xf32, #tpu.memory_space<vmem>>, %arg15: memref<8x32xf32, #tpu.memory_space<vmem>>, %arg16: memref<8x32xf32, #tpu.memory_space<vmem>>) attributes {dimension_semantics = [#tpu.dimension_semantics<parallel>, #tpu.dimension_semantics<arbitrary>], iteration_bounds = array<i64: 1, 1>, scalar_prefetch = 0 : i64, scratch_operands = 5 : i64, tpu.core_type = #tpu.core_type<tc>, window_params = [{transform_indices = @transform_0, window_bounds = array<i64: 8, 8, 16>}, {pipeline_mode = #tpu.pipeline_mode<synchronous>, transform_indices = @transform_1, window_bounds = array<i64: 16, 128>}, {pipeline_mode = #tpu.pipeline_mode<synchronous>, transform_indices = @transform_2, window_bounds = array<i64: 32, 128>}, {pipeline_mode = #tpu.pipeline_mode<synchronous>, transform_indices = @transform_3, window_bounds = array<i64: 1, 128>}, {pipeline_mode = #tpu.pipeline_mode<synchronous>, transform_indices = @transform_4, window_bounds = array<i64: 32, 128>}, {pipeline_mode = #tpu.pipeline_mode<synchronous>, transform_indices = @transform_5, window_bounds = array<i64: 32, 128>}, {pipeline_mode = #tpu.pipeline_mode<synchronous>, transform_indices = @transform_6, window_bounds = array<i64: 1, 128>}, {pipeline_mode = #tpu.pipeline_mode<synchronous>, transform_indices = @transform_7, window_bounds = array<i64: 32, 8>}, {pipeline_mode = #tpu.pipeline_mode<synchronous>, transform_indices = @transform_8, window_bounds = array<i64: 1, 8>}, {transform_indices = @transform_9, window_bounds = array<i64: 8, 8>}]} {
    %c0_i32 = arith.constant 0 : i32
    %0 = arith.cmpi eq, %arg1, %c0_i32 : i32
    %1 = arith.extui %0 : i1 to i32
    %c0_i32_0 = arith.constant 0 : i32
    %2 = arith.cmpi ne, %1, %c0_i32_0 : i32
    scf.if %2 {
      %cst_110 = arith.constant 0.000000e+00 : f32
      %461 = vector.broadcast %cst_110 : f32 to vector<8x32xf32>
      %c0_111 = arith.constant 0 : index
      %c0_112 = arith.constant 0 : index
      %462 = vector.load %arg13[%c0_111, %c0_112] : memref<8x32xf32, #tpu.memory_space<vmem>>, vector<8x32xf32>
      tpu.vector_store %arg13[%c0_111, %c0_112], %461 {strides = array<i32>} : memref<8x32xf32, #tpu.memory_space<vmem>>, vector<8x32xf32>,
      %cst_113 = arith.constant 0.000000e+00 : f32
      %463 = vector.broadcast %cst_113 : f32 to vector<8x32xf32>
      %c0_114 = arith.constant 0 : index
      %c0_115 = arith.constant 0 : index
      %464 = vector.load %arg14[%c0_114, %c0_115] : memref<8x32xf32, #tpu.memory_space<vmem>>, vector<8x32xf32>
      tpu.vector_store %arg14[%c0_114, %c0_115], %463 {strides = array<i32>} : memref<8x32xf32, #tpu.memory_space<vmem>>, vector<8x32xf32>,
      %cst_116 = arith.constant 0.000000e+00 : f32
      %465 = vector.broadcast %cst_116 : f32 to vector<8x32xf32>
      %c0_117 = arith.constant 0 : index
      %c0_118 = arith.constant 0 : index
      %466 = vector.load %arg15[%c0_117, %c0_118] : memref<8x32xf32, #tpu.memory_space<vmem>>, vector<8x32xf32>
      tpu.vector_store %arg15[%c0_117, %c0_118], %465 {strides = array<i32>} : memref<8x32xf32, #tpu.memory_space<vmem>>, vector<8x32xf32>,
      %cst_119 = arith.constant 0.000000e+00 : f32
      %467 = vector.broadcast %cst_119 : f32 to vector<8x32xf32>
      %c0_120 = arith.constant 0 : index
      %c0_121 = arith.constant 0 : index
      %468 = vector.load %arg16[%c0_120, %c0_121] : memref<8x32xf32, #tpu.memory_space<vmem>>, vector<8x32xf32>
      tpu.vector_store %arg16[%c0_120, %c0_121], %467 {strides = array<i32>} : memref<8x32xf32, #tpu.memory_space<vmem>>, vector<8x32xf32>,
    } else {
    }
    %c0 = arith.constant 0 : index
    %c0_1 = arith.constant 0 : index
    %c0_2 = arith.constant 0 : index
    %3 = vector.load %arg2[%c0, %c0_1, %c0_2] : memref<8x8x16xf32, #tpu.memory_space<vmem>>, vector<8x8x16xf32>
    %4 = vector.shape_cast %3 : vector<8x8x16xf32> to vector<64x16xf32>
    %5 = arith.truncf %4 : vector<64x16xf32> to vector<64x16xbf16>
    %c0_3 = arith.constant 0 : index
    %c0_4 = arith.constant 0 : index
    %6 = vector.load %arg3[%c0_3, %c0_4] : memref<16x128xbf16, #tpu.memory_space<vmem>>, vector<16x128xbf16>
    %cst = arith.constant dense<0.000000e+00> : vector<64x128xf32>
    %7 = tpu.matmul %5, %6, %cst {dimension_numbers = #tpu.dot_dimension_numbers<[1], [0], [0], [1], [0, 0, 1, 1], [], []>} : vector<64x16xbf16>, vector<16x128xbf16>, vector<64x128xf32> -> vector<64x128xf32>
    %c0_5 = arith.constant 0 : index
    %c0_6 = arith.constant 0 : index
    %8 = vector.load %arg5[%c0_5, %c0_6] : memref<1x128xf32, #tpu.memory_space<vmem>>, vector<1x128xf32>
    %9 = vector.broadcast %8 : vector<1x128xf32> to vector<64x128xf32>
    %10 = arith.addf %7, %9 : vector<64x128xf32>
    %11 = vector.shape_cast %10 : vector<64x128xf32> to vector<8x8x128xf32>
    %c0_7 = arith.constant 0 : index
    %c0_8 = arith.constant 0 : index
    %c0_9 = arith.constant 0 : index
    %12 = vector.load %arg12[%c0_7, %c0_8, %c0_9] : memref<8x8x128xf32, #tpu.memory_space<vmem>>, vector<8x8x128xf32>
    tpu.vector_store %arg12[%c0_7, %c0_8, %c0_9], %11 {strides = array<i32>} : memref<8x8x128xf32, #tpu.memory_space<vmem>>, vector<8x8x128xf32>,
    %c0_10 = arith.constant 0 : index
    %c0_11 = arith.constant 0 : index
    %13 = vector.load %arg4[%c0_10, %c0_11] : memref<32x128xbf16, #tpu.memory_space<vmem>>, vector<32x128xbf16>
    %c0_12 = arith.constant 0 : index
    %c0_13 = arith.constant 0 : index
    %14 = vector.load %arg6[%c0_12, %c0_13] : memref<32x128xbf16, #tpu.memory_space<vmem>>, vector<32x128xbf16>
    %c0_14 = arith.constant 0 : index
    %c0_15 = arith.constant 0 : index
    %15 = vector.load %arg7[%c0_14, %c0_15] : memref<32x128xbf16, #tpu.memory_space<vmem>>, vector<32x128xbf16>
    %c0_16 = arith.constant 0 : index
    %c0_17 = arith.constant 0 : index
    %16 = vector.load %arg8[%c0_16, %c0_17] : memref<1x128xf32, #tpu.memory_space<vmem>>, vector<1x128xf32>
    %c0_18 = arith.constant 0 : index
    %c0_19 = arith.constant 0 : index
    %17 = vector.load %arg13[%c0_18, %c0_19] : memref<8x32xf32, #tpu.memory_space<vmem>>, vector<8x32xf32>
    %c0_20 = arith.constant 0 : index
    %c0_21 = arith.constant 0 : index
    %18 = vector.load %arg14[%c0_20, %c0_21] : memref<8x32xf32, #tpu.memory_space<vmem>>, vector<8x32xf32>
    %c0_22 = arith.constant 0 : index
    %c0_23 = arith.constant 0 : index
    %19 = vector.load %arg15[%c0_22, %c0_23] : memref<8x32xf32, #tpu.memory_space<vmem>>, vector<8x32xf32>
    %c0_24 = arith.constant 0 : index
    %c0_25 = arith.constant 0 : index
    %20 = vector.load %arg16[%c0_24, %c0_25] : memref<8x32xf32, #tpu.memory_space<vmem>>, vector<8x32xf32>
    %c0_i32_26 = arith.constant 0 : i32
    %21 = arith.cmpi eq, %arg1, %c0_i32_26 : i32
    %c0_i32_27 = arith.constant 0 : i32
    %22 = arith.truncf %17 : vector<8x32xf32> to vector<8x32xbf16>
    %cst_28 = arith.constant dense<0.000000e+00> : vector<8x128xf32>
    %23 = tpu.matmul %22, %14, %cst_28 {dimension_numbers = #tpu.dot_dimension_numbers<[1], [0], [0], [1], [0, 0, 1, 1], [], []>} : vector<8x32xbf16>, vector<32x128xbf16>, vector<8x128xf32> -> vector<8x128xf32>
    %24 = arith.truncf %19 : vector<8x32xf32> to vector<8x32xbf16>
    %cst_29 = arith.constant dense<0.000000e+00> : vector<8x128xf32>
    %25 = tpu.matmul %24, %15, %cst_29 {dimension_numbers = #tpu.dot_dimension_numbers<[1], [0], [0], [1], [0, 0, 1, 1], [], []>} : vector<8x32xbf16>, vector<32x128xbf16>, vector<8x128xf32> -> vector<8x128xf32>
    %26 = arith.addf %23, %25 : vector<8x128xf32>
    %27 = vector.broadcast %16 : vector<1x128xf32> to vector<8x128xf32>
    %28 = arith.addf %26, %27 : vector<8x128xf32>
    %29 = vector.extract_strided_slice %28 {offsets = [0, 0], sizes = [8, 96], strides = [1, 1]} : vector<8x128xf32> to vector<8x96xf32>
    %30 = arith.negf %29 : vector<8x96xf32>
    %31 = math.exp %30 : vector<8x96xf32>
    %cst_30 = arith.constant 1.000000e+00 : f32
    %32 = vector.broadcast %cst_30 : f32 to vector<8x96xf32>
    %33 = arith.addf %32, %31 : vector<8x96xf32>
    %34 = arith.divf %32, %33 : vector<8x96xf32>
    %35 = vector.extract_strided_slice %34 {offsets = [0, 0], sizes = [8, 32], strides = [1, 1]} : vector<8x96xf32> to vector<8x32xf32>
    %36 = vector.extract_strided_slice %34 {offsets = [0, 32], sizes = [8, 32], strides = [1, 1]} : vector<8x96xf32> to vector<8x32xf32>
    %37 = vector.extract_strided_slice %34 {offsets = [0, 64], sizes = [8, 32], strides = [1, 1]} : vector<8x96xf32> to vector<8x32xf32>
    %38 = vector.extract_strided_slice %28 {offsets = [0, 96], sizes = [8, 32], strides = [1, 1]} : vector<8x128xf32> to vector<8x32xf32>
    %39 = math.tanh %38 : vector<8x32xf32>
    %40 = arith.mulf %36, %20 : vector<8x32xf32>
    %41 = arith.mulf %35, %39 : vector<8x32xf32>
    %42 = arith.addf %40, %41 : vector<8x32xf32>
    %43 = math.tanh %42 : vector<8x32xf32>
    %44 = arith.mulf %37, %43 : vector<8x32xf32>
    %45 = arith.index_cast %c0_i32_27 : i32 to index
    %c0_31 = arith.constant 0 : index
    %c0_32 = arith.constant 0 : index
    %46 = vector.load %arg12[%45, %c0_31, %c0_32] : memref<8x8x128xf32, #tpu.memory_space<vmem>>, vector<1x8x128xf32>
    %47 = vector.shape_cast %46 : vector<1x8x128xf32> to vector<8x128xf32>
    %48 = arith.truncf %17 : vector<8x32xf32> to vector<8x32xbf16>
    %cst_33 = arith.constant dense<0.000000e+00> : vector<8x128xf32>
    %49 = tpu.matmul %48, %13, %cst_33 {dimension_numbers = #tpu.dot_dimension_numbers<[1], [0], [0], [1], [0, 0, 1, 1], [], []>} : vector<8x32xbf16>, vector<32x128xbf16>, vector<8x128xf32> -> vector<8x128xf32>
    %50 = arith.addf %47, %49 : vector<8x128xf32>
    %51 = vector.extract_strided_slice %50 {offsets = [0, 0], sizes = [8, 96], strides = [1, 1]} : vector<8x128xf32> to vector<8x96xf32>
    %52 = arith.negf %51 : vector<8x96xf32>
    %53 = math.exp %52 : vector<8x96xf32>
    %cst_34 = arith.constant 1.000000e+00 : f32
    %54 = vector.broadcast %cst_34 : f32 to vector<8x96xf32>
    %55 = arith.addf %54, %53 : vector<8x96xf32>
    %56 = arith.divf %54, %55 : vector<8x96xf32>
    %57 = vector.extract_strided_slice %56 {offsets = [0, 0], sizes = [8, 32], strides = [1, 1]} : vector<8x96xf32> to vector<8x32xf32>
    %58 = vector.extract_strided_slice %56 {offsets = [0, 32], sizes = [8, 32], strides = [1, 1]} : vector<8x96xf32> to vector<8x32xf32>
    %59 = vector.extract_strided_slice %56 {offsets = [0, 64], sizes = [8, 32], strides = [1, 1]} : vector<8x96xf32> to vector<8x32xf32>
    %60 = vector.extract_strided_slice %50 {offsets = [0, 96], sizes = [8, 32], strides = [1, 1]} : vector<8x128xf32> to vector<8x32xf32>
    %61 = math.tanh %60 : vector<8x32xf32>
    %62 = arith.mulf %58, %18 : vector<8x32xf32>
    %63 = arith.mulf %57, %61 : vector<8x32xf32>
    %64 = arith.addf %62, %63 : vector<8x32xf32>
    %65 = math.tanh %64 : vector<8x32xf32>
    %66 = arith.mulf %59, %65 : vector<8x32xf32>
    %c0_i32_35 = arith.constant 0 : i32
    %67 = arith.cmpi eq, %c0_i32_27, %c0_i32_35 : i32
    %68 = arith.andi %21, %67 : i1
    %69 = arith.extui %68 : i1 to i32
    %70 = arith.sitofp %69 : i32 to f32
    %cst_36 = arith.constant 1.000000e+00 : f32
    %71 = arith.subf %cst_36, %70 : f32
    %72 = vector.broadcast %71 : f32 to vector<8x32xf32>
    %73 = arith.mulf %44, %72 : vector<8x32xf32>
    %74 = vector.broadcast %71 : f32 to vector<8x32xf32>
    %75 = arith.mulf %42, %74 : vector<8x32xf32>
    %c1_i32 = arith.constant 1 : i32
    %76 = arith.truncf %66 : vector<8x32xf32> to vector<8x32xbf16>
    %cst_37 = arith.constant dense<0.000000e+00> : vector<8x128xf32>
    %77 = tpu.matmul %76, %14, %cst_37 {dimension_numbers = #tpu.dot_dimension_numbers<[1], [0], [0], [1], [0, 0, 1, 1], [], []>} : vector<8x32xbf16>, vector<32x128xbf16>, vector<8x128xf32> -> vector<8x128xf32>
    %78 = arith.truncf %73 : vector<8x32xf32> to vector<8x32xbf16>
    %cst_38 = arith.constant dense<0.000000e+00> : vector<8x128xf32>
    %79 = tpu.matmul %78, %15, %cst_38 {dimension_numbers = #tpu.dot_dimension_numbers<[1], [0], [0], [1], [0, 0, 1, 1], [], []>} : vector<8x32xbf16>, vector<32x128xbf16>, vector<8x128xf32> -> vector<8x128xf32>
    %80 = arith.addf %77, %79 : vector<8x128xf32>
    %81 = vector.broadcast %16 : vector<1x128xf32> to vector<8x128xf32>
    %82 = arith.addf %80, %81 : vector<8x128xf32>
    %83 = vector.extract_strided_slice %82 {offsets = [0, 0], sizes = [8, 96], strides = [1, 1]} : vector<8x128xf32> to vector<8x96xf32>
    %84 = arith.negf %83 : vector<8x96xf32>
    %85 = math.exp %84 : vector<8x96xf32>
    %cst_39 = arith.constant 1.000000e+00 : f32
    %86 = vector.broadcast %cst_39 : f32 to vector<8x96xf32>
    %87 = arith.addf %86, %85 : vector<8x96xf32>
    %88 = arith.divf %86, %87 : vector<8x96xf32>
    %89 = vector.extract_strided_slice %88 {offsets = [0, 0], sizes = [8, 32], strides = [1, 1]} : vector<8x96xf32> to vector<8x32xf32>
    %90 = vector.extract_strided_slice %88 {offsets = [0, 32], sizes = [8, 32], strides = [1, 1]} : vector<8x96xf32> to vector<8x32xf32>
    %91 = vector.extract_strided_slice %88 {offsets = [0, 64], sizes = [8, 32], strides = [1, 1]} : vector<8x96xf32> to vector<8x32xf32>
    %92 = vector.extract_strided_slice %82 {offsets = [0, 96], sizes = [8, 32], strides = [1, 1]} : vector<8x128xf32> to vector<8x32xf32>
    %93 = math.tanh %92 : vector<8x32xf32>
    %94 = arith.mulf %90, %75 : vector<8x32xf32>
    %95 = arith.mulf %89, %93 : vector<8x32xf32>
    %96 = arith.addf %94, %95 : vector<8x32xf32>
    %97 = math.tanh %96 : vector<8x32xf32>
    %98 = arith.mulf %91, %97 : vector<8x32xf32>
    %99 = arith.index_cast %c1_i32 : i32 to index
    %c0_40 = arith.constant 0 : index
    %c0_41 = arith.constant 0 : index
    %100 = vector.load %arg12[%99, %c0_40, %c0_41] : memref<8x8x128xf32, #tpu.memory_space<vmem>>, vector<1x8x128xf32>
    %101 = vector.shape_cast %100 : vector<1x8x128xf32> to vector<8x128xf32>
    %102 = arith.truncf %66 : vector<8x32xf32> to vector<8x32xbf16>
    %cst_42 = arith.constant dense<0.000000e+00> : vector<8x128xf32>
    %103 = tpu.matmul %102, %13, %cst_42 {dimension_numbers = #tpu.dot_dimension_numbers<[1], [0], [0], [1], [0, 0, 1, 1], [], []>} : vector<8x32xbf16>, vector<32x128xbf16>, vector<8x128xf32> -> vector<8x128xf32>
    %104 = arith.addf %101, %103 : vector<8x128xf32>
    %105 = vector.extract_strided_slice %104 {offsets = [0, 0], sizes = [8, 96], strides = [1, 1]} : vector<8x128xf32> to vector<8x96xf32>
    %106 = arith.negf %105 : vector<8x96xf32>
    %107 = math.exp %106 : vector<8x96xf32>
    %cst_43 = arith.constant 1.000000e+00 : f32
    %108 = vector.broadcast %cst_43 : f32 to vector<8x96xf32>
    %109 = arith.addf %108, %107 : vector<8x96xf32>
    %110 = arith.divf %108, %109 : vector<8x96xf32>
    %111 = vector.extract_strided_slice %110 {offsets = [0, 0], sizes = [8, 32], strides = [1, 1]} : vector<8x96xf32> to vector<8x32xf32>
    %112 = vector.extract_strided_slice %110 {offsets = [0, 32], sizes = [8, 32], strides = [1, 1]} : vector<8x96xf32> to vector<8x32xf32>
    %113 = vector.extract_strided_slice %110 {offsets = [0, 64], sizes = [8, 32], strides = [1, 1]} : vector<8x96xf32> to vector<8x32xf32>
    %114 = vector.extract_strided_slice %104 {offsets = [0, 96], sizes = [8, 32], strides = [1, 1]} : vector<8x128xf32> to vector<8x32xf32>
    %115 = math.tanh %114 : vector<8x32xf32>
    %116 = arith.mulf %112, %64 : vector<8x32xf32>
    %117 = arith.mulf %111, %115 : vector<8x32xf32>
    %118 = arith.addf %116, %117 : vector<8x32xf32>
    %119 = math.tanh %118 : vector<8x32xf32>
    %120 = arith.mulf %113, %119 : vector<8x32xf32>
    %c0_i32_44 = arith.constant 0 : i32
    %121 = arith.cmpi eq, %c1_i32, %c0_i32_44 : i32
    %122 = arith.andi %21, %121 : i1
    %123 = arith.extui %122 : i1 to i32
    %124 = arith.sitofp %123 : i32 to f32
    %cst_45 = arith.constant 1.000000e+00 : f32
    %125 = arith.subf %cst_45, %124 : f32
    %126 = vector.broadcast %125 : f32 to vector<8x32xf32>
    %127 = arith.mulf %98, %126 : vector<8x32xf32>
    %128 = vector.broadcast %125 : f32 to vector<8x32xf32>
    %129 = arith.mulf %96, %128 : vector<8x32xf32>
    %c2_i32 = arith.constant 2 : i32
    %130 = arith.truncf %120 : vector<8x32xf32> to vector<8x32xbf16>
    %cst_46 = arith.constant dense<0.000000e+00> : vector<8x128xf32>
    %131 = tpu.matmul %130, %14, %cst_46 {dimension_numbers = #tpu.dot_dimension_numbers<[1], [0], [0], [1], [0, 0, 1, 1], [], []>} : vector<8x32xbf16>, vector<32x128xbf16>, vector<8x128xf32> -> vector<8x128xf32>
    %132 = arith.truncf %127 : vector<8x32xf32> to vector<8x32xbf16>
    %cst_47 = arith.constant dense<0.000000e+00> : vector<8x128xf32>
    %133 = tpu.matmul %132, %15, %cst_47 {dimension_numbers = #tpu.dot_dimension_numbers<[1], [0], [0], [1], [0, 0, 1, 1], [], []>} : vector<8x32xbf16>, vector<32x128xbf16>, vector<8x128xf32> -> vector<8x128xf32>
    %134 = arith.addf %131, %133 : vector<8x128xf32>
    %135 = vector.broadcast %16 : vector<1x128xf32> to vector<8x128xf32>
    %136 = arith.addf %134, %135 : vector<8x128xf32>
    %137 = vector.extract_strided_slice %136 {offsets = [0, 0], sizes = [8, 96], strides = [1, 1]} : vector<8x128xf32> to vector<8x96xf32>
    %138 = arith.negf %137 : vector<8x96xf32>
    %139 = math.exp %138 : vector<8x96xf32>
    %cst_48 = arith.constant 1.000000e+00 : f32
    %140 = vector.broadcast %cst_48 : f32 to vector<8x96xf32>
    %141 = arith.addf %140, %139 : vector<8x96xf32>
    %142 = arith.divf %140, %141 : vector<8x96xf32>
    %143 = vector.extract_strided_slice %142 {offsets = [0, 0], sizes = [8, 32], strides = [1, 1]} : vector<8x96xf32> to vector<8x32xf32>
    %144 = vector.extract_strided_slice %142 {offsets = [0, 32], sizes = [8, 32], strides = [1, 1]} : vector<8x96xf32> to vector<8x32xf32>
    %145 = vector.extract_strided_slice %142 {offsets = [0, 64], sizes = [8, 32], strides = [1, 1]} : vector<8x96xf32> to vector<8x32xf32>
    %146 = vector.extract_strided_slice %136 {offsets = [0, 96], sizes = [8, 32], strides = [1, 1]} : vector<8x128xf32> to vector<8x32xf32>
    %147 = math.tanh %146 : vector<8x32xf32>
    %148 = arith.mulf %144, %129 : vector<8x32xf32>
    %149 = arith.mulf %143, %147 : vector<8x32xf32>
    %150 = arith.addf %148, %149 : vector<8x32xf32>
    %151 = math.tanh %150 : vector<8x32xf32>
    %152 = arith.mulf %145, %151 : vector<8x32xf32>
    %153 = arith.index_cast %c2_i32 : i32 to index
    %c0_49 = arith.constant 0 : index
    %c0_50 = arith.constant 0 : index
    %154 = vector.load %arg12[%153, %c0_49, %c0_50] : memref<8x8x128xf32, #tpu.memory_space<vmem>>, vector<1x8x128xf32>
    %155 = vector.shape_cast %154 : vector<1x8x128xf32> to vector<8x128xf32>
    %156 = arith.truncf %120 : vector<8x32xf32> to vector<8x32xbf16>
    %cst_51 = arith.constant dense<0.000000e+00> : vector<8x128xf32>
    %157 = tpu.matmul %156, %13, %cst_51 {dimension_numbers = #tpu.dot_dimension_numbers<[1], [0], [0], [1], [0, 0, 1, 1], [], []>} : vector<8x32xbf16>, vector<32x128xbf16>, vector<8x128xf32> -> vector<8x128xf32>
    %158 = arith.addf %155, %157 : vector<8x128xf32>
    %159 = vector.extract_strided_slice %158 {offsets = [0, 0], sizes = [8, 96], strides = [1, 1]} : vector<8x128xf32> to vector<8x96xf32>
    %160 = arith.negf %159 : vector<8x96xf32>
    %161 = math.exp %160 : vector<8x96xf32>
    %cst_52 = arith.constant 1.000000e+00 : f32
    %162 = vector.broadcast %cst_52 : f32 to vector<8x96xf32>
    %163 = arith.addf %162, %161 : vector<8x96xf32>
    %164 = arith.divf %162, %163 : vector<8x96xf32>
    %165 = vector.extract_strided_slice %164 {offsets = [0, 0], sizes = [8, 32], strides = [1, 1]} : vector<8x96xf32> to vector<8x32xf32>
    %166 = vector.extract_strided_slice %164 {offsets = [0, 32], sizes = [8, 32], strides = [1, 1]} : vector<8x96xf32> to vector<8x32xf32>
    %167 = vector.extract_strided_slice %164 {offsets = [0, 64], sizes = [8, 32], strides = [1, 1]} : vector<8x96xf32> to vector<8x32xf32>
    %168 = vector.extract_strided_slice %158 {offsets = [0, 96], sizes = [8, 32], strides = [1, 1]} : vector<8x128xf32> to vector<8x32xf32>
    %169 = math.tanh %168 : vector<8x32xf32>
    %170 = arith.mulf %166, %118 : vector<8x32xf32>
    %171 = arith.mulf %165, %169 : vector<8x32xf32>
    %172 = arith.addf %170, %171 : vector<8x32xf32>
    %173 = math.tanh %172 : vector<8x32xf32>
    %174 = arith.mulf %167, %173 : vector<8x32xf32>
    %c0_i32_53 = arith.constant 0 : i32
    %175 = arith.cmpi eq, %c2_i32, %c0_i32_53 : i32
    %176 = arith.andi %21, %175 : i1
    %177 = arith.extui %176 : i1 to i32
    %178 = arith.sitofp %177 : i32 to f32
    %cst_54 = arith.constant 1.000000e+00 : f32
    %179 = arith.subf %cst_54, %178 : f32
    %180 = vector.broadcast %179 : f32 to vector<8x32xf32>
    %181 = arith.mulf %152, %180 : vector<8x32xf32>
    %182 = vector.broadcast %179 : f32 to vector<8x32xf32>
    %183 = arith.mulf %150, %182 : vector<8x32xf32>
    %c3_i32 = arith.constant 3 : i32
    %184 = arith.truncf %174 : vector<8x32xf32> to vector<8x32xbf16>
    %cst_55 = arith.constant dense<0.000000e+00> : vector<8x128xf32>
    %185 = tpu.matmul %184, %14, %cst_55 {dimension_numbers = #tpu.dot_dimension_numbers<[1], [0], [0], [1], [0, 0, 1, 1], [], []>} : vector<8x32xbf16>, vector<32x128xbf16>, vector<8x128xf32> -> vector<8x128xf32>
    %186 = arith.truncf %181 : vector<8x32xf32> to vector<8x32xbf16>
    %cst_56 = arith.constant dense<0.000000e+00> : vector<8x128xf32>
    %187 = tpu.matmul %186, %15, %cst_56 {dimension_numbers = #tpu.dot_dimension_numbers<[1], [0], [0], [1], [0, 0, 1, 1], [], []>} : vector<8x32xbf16>, vector<32x128xbf16>, vector<8x128xf32> -> vector<8x128xf32>
    %188 = arith.addf %185, %187 : vector<8x128xf32>
    %189 = vector.broadcast %16 : vector<1x128xf32> to vector<8x128xf32>
    %190 = arith.addf %188, %189 : vector<8x128xf32>
    %191 = vector.extract_strided_slice %190 {offsets = [0, 0], sizes = [8, 96], strides = [1, 1]} : vector<8x128xf32> to vector<8x96xf32>
    %192 = arith.negf %191 : vector<8x96xf32>
    %193 = math.exp %192 : vector<8x96xf32>
    %cst_57 = arith.constant 1.000000e+00 : f32
    %194 = vector.broadcast %cst_57 : f32 to vector<8x96xf32>
    %195 = arith.addf %194, %193 : vector<8x96xf32>
    %196 = arith.divf %194, %195 : vector<8x96xf32>
    %197 = vector.extract_strided_slice %196 {offsets = [0, 0], sizes = [8, 32], strides = [1, 1]} : vector<8x96xf32> to vector<8x32xf32>
    %198 = vector.extract_strided_slice %196 {offsets = [0, 32], sizes = [8, 32], strides = [1, 1]} : vector<8x96xf32> to vector<8x32xf32>
    %199 = vector.extract_strided_slice %196 {offsets = [0, 64], sizes = [8, 32], strides = [1, 1]} : vector<8x96xf32> to vector<8x32xf32>
    %200 = vector.extract_strided_slice %190 {offsets = [0, 96], sizes = [8, 32], strides = [1, 1]} : vector<8x128xf32> to vector<8x32xf32>
    %201 = math.tanh %200 : vector<8x32xf32>
    %202 = arith.mulf %198, %183 : vector<8x32xf32>
    %203 = arith.mulf %197, %201 : vector<8x32xf32>
    %204 = arith.addf %202, %203 : vector<8x32xf32>
    %205 = math.tanh %204 : vector<8x32xf32>
    %206 = arith.mulf %199, %205 : vector<8x32xf32>
    %207 = arith.index_cast %c3_i32 : i32 to index
    %c0_58 = arith.constant 0 : index
    %c0_59 = arith.constant 0 : index
    %208 = vector.load %arg12[%207, %c0_58, %c0_59] : memref<8x8x128xf32, #tpu.memory_space<vmem>>, vector<1x8x128xf32>
    %209 = vector.shape_cast %208 : vector<1x8x128xf32> to vector<8x128xf32>
    %210 = arith.truncf %174 : vector<8x32xf32> to vector<8x32xbf16>
    %cst_60 = arith.constant dense<0.000000e+00> : vector<8x128xf32>
    %211 = tpu.matmul %210, %13, %cst_60 {dimension_numbers = #tpu.dot_dimension_numbers<[1], [0], [0], [1], [0, 0, 1, 1], [], []>} : vector<8x32xbf16>, vector<32x128xbf16>, vector<8x128xf32> -> vector<8x128xf32>
    %212 = arith.addf %209, %211 : vector<8x128xf32>
    %213 = vector.extract_strided_slice %212 {offsets = [0, 0], sizes = [8, 96], strides = [1, 1]} : vector<8x128xf32> to vector<8x96xf32>
    %214 = arith.negf %213 : vector<8x96xf32>
    %215 = math.exp %214 : vector<8x96xf32>
    %cst_61 = arith.constant 1.000000e+00 : f32
    %216 = vector.broadcast %cst_61 : f32 to vector<8x96xf32>
    %217 = arith.addf %216, %215 : vector<8x96xf32>
    %218 = arith.divf %216, %217 : vector<8x96xf32>
    %219 = vector.extract_strided_slice %218 {offsets = [0, 0], sizes = [8, 32], strides = [1, 1]} : vector<8x96xf32> to vector<8x32xf32>
    %220 = vector.extract_strided_slice %218 {offsets = [0, 32], sizes = [8, 32], strides = [1, 1]} : vector<8x96xf32> to vector<8x32xf32>
    %221 = vector.extract_strided_slice %218 {offsets = [0, 64], sizes = [8, 32], strides = [1, 1]} : vector<8x96xf32> to vector<8x32xf32>
    %222 = vector.extract_strided_slice %212 {offsets = [0, 96], sizes = [8, 32], strides = [1, 1]} : vector<8x128xf32> to vector<8x32xf32>
    %223 = math.tanh %222 : vector<8x32xf32>
    %224 = arith.mulf %220, %172 : vector<8x32xf32>
    %225 = arith.mulf %219, %223 : vector<8x32xf32>
    %226 = arith.addf %224, %225 : vector<8x32xf32>
    %227 = math.tanh %226 : vector<8x32xf32>
    %228 = arith.mulf %221, %227 : vector<8x32xf32>
    %c0_i32_62 = arith.constant 0 : i32
    %229 = arith.cmpi eq, %c3_i32, %c0_i32_62 : i32
    %230 = arith.andi %21, %229 : i1
    %231 = arith.extui %230 : i1 to i32
    %232 = arith.sitofp %231 : i32 to f32
    %cst_63 = arith.constant 1.000000e+00 : f32
    %233 = arith.subf %cst_63, %232 : f32
    %234 = vector.broadcast %233 : f32 to vector<8x32xf32>
    %235 = arith.mulf %206, %234 : vector<8x32xf32>
    %236 = vector.broadcast %233 : f32 to vector<8x32xf32>
    %237 = arith.mulf %204, %236 : vector<8x32xf32>
    %c4_i32 = arith.constant 4 : i32
    %238 = arith.truncf %228 : vector<8x32xf32> to vector<8x32xbf16>
    %cst_64 = arith.constant dense<0.000000e+00> : vector<8x128xf32>
    %239 = tpu.matmul %238, %14, %cst_64 {dimension_numbers = #tpu.dot_dimension_numbers<[1], [0], [0], [1], [0, 0, 1, 1], [], []>} : vector<8x32xbf16>, vector<32x128xbf16>, vector<8x128xf32> -> vector<8x128xf32>
    %240 = arith.truncf %235 : vector<8x32xf32> to vector<8x32xbf16>
    %cst_65 = arith.constant dense<0.000000e+00> : vector<8x128xf32>
    %241 = tpu.matmul %240, %15, %cst_65 {dimension_numbers = #tpu.dot_dimension_numbers<[1], [0], [0], [1], [0, 0, 1, 1], [], []>} : vector<8x32xbf16>, vector<32x128xbf16>, vector<8x128xf32> -> vector<8x128xf32>
    %242 = arith.addf %239, %241 : vector<8x128xf32>
    %243 = vector.broadcast %16 : vector<1x128xf32> to vector<8x128xf32>
    %244 = arith.addf %242, %243 : vector<8x128xf32>
    %245 = vector.extract_strided_slice %244 {offsets = [0, 0], sizes = [8, 96], strides = [1, 1]} : vector<8x128xf32> to vector<8x96xf32>
    %246 = arith.negf %245 : vector<8x96xf32>
    %247 = math.exp %246 : vector<8x96xf32>
    %cst_66 = arith.constant 1.000000e+00 : f32
    %248 = vector.broadcast %cst_66 : f32 to vector<8x96xf32>
    %249 = arith.addf %248, %247 : vector<8x96xf32>
    %250 = arith.divf %248, %249 : vector<8x96xf32>
    %251 = vector.extract_strided_slice %250 {offsets = [0, 0], sizes = [8, 32], strides = [1, 1]} : vector<8x96xf32> to vector<8x32xf32>
    %252 = vector.extract_strided_slice %250 {offsets = [0, 32], sizes = [8, 32], strides = [1, 1]} : vector<8x96xf32> to vector<8x32xf32>
    %253 = vector.extract_strided_slice %250 {offsets = [0, 64], sizes = [8, 32], strides = [1, 1]} : vector<8x96xf32> to vector<8x32xf32>
    %254 = vector.extract_strided_slice %244 {offsets = [0, 96], sizes = [8, 32], strides = [1, 1]} : vector<8x128xf32> to vector<8x32xf32>
    %255 = math.tanh %254 : vector<8x32xf32>
    %256 = arith.mulf %252, %237 : vector<8x32xf32>
    %257 = arith.mulf %251, %255 : vector<8x32xf32>
    %258 = arith.addf %256, %257 : vector<8x32xf32>
    %259 = math.tanh %258 : vector<8x32xf32>
    %260 = arith.mulf %253, %259 : vector<8x32xf32>
    %261 = arith.index_cast %c4_i32 : i32 to index
    %c0_67 = arith.constant 0 : index
    %c0_68 = arith.constant 0 : index
    %262 = vector.load %arg12[%261, %c0_67, %c0_68] : memref<8x8x128xf32, #tpu.memory_space<vmem>>, vector<1x8x128xf32>
    %263 = vector.shape_cast %262 : vector<1x8x128xf32> to vector<8x128xf32>
    %264 = arith.truncf %228 : vector<8x32xf32> to vector<8x32xbf16>
    %cst_69 = arith.constant dense<0.000000e+00> : vector<8x128xf32>
    %265 = tpu.matmul %264, %13, %cst_69 {dimension_numbers = #tpu.dot_dimension_numbers<[1], [0], [0], [1], [0, 0, 1, 1], [], []>} : vector<8x32xbf16>, vector<32x128xbf16>, vector<8x128xf32> -> vector<8x128xf32>
    %266 = arith.addf %263, %265 : vector<8x128xf32>
    %267 = vector.extract_strided_slice %266 {offsets = [0, 0], sizes = [8, 96], strides = [1, 1]} : vector<8x128xf32> to vector<8x96xf32>
    %268 = arith.negf %267 : vector<8x96xf32>
    %269 = math.exp %268 : vector<8x96xf32>
    %cst_70 = arith.constant 1.000000e+00 : f32
    %270 = vector.broadcast %cst_70 : f32 to vector<8x96xf32>
    %271 = arith.addf %270, %269 : vector<8x96xf32>
    %272 = arith.divf %270, %271 : vector<8x96xf32>
    %273 = vector.extract_strided_slice %272 {offsets = [0, 0], sizes = [8, 32], strides = [1, 1]} : vector<8x96xf32> to vector<8x32xf32>
    %274 = vector.extract_strided_slice %272 {offsets = [0, 32], sizes = [8, 32], strides = [1, 1]} : vector<8x96xf32> to vector<8x32xf32>
    %275 = vector.extract_strided_slice %272 {offsets = [0, 64], sizes = [8, 32], strides = [1, 1]} : vector<8x96xf32> to vector<8x32xf32>
    %276 = vector.extract_strided_slice %266 {offsets = [0, 96], sizes = [8, 32], strides = [1, 1]} : vector<8x128xf32> to vector<8x32xf32>
    %277 = math.tanh %276 : vector<8x32xf32>
    %278 = arith.mulf %274, %226 : vector<8x32xf32>
    %279 = arith.mulf %273, %277 : vector<8x32xf32>
    %280 = arith.addf %278, %279 : vector<8x32xf32>
    %281 = math.tanh %280 : vector<8x32xf32>
    %282 = arith.mulf %275, %281 : vector<8x32xf32>
    %c0_i32_71 = arith.constant 0 : i32
    %283 = arith.cmpi eq, %c4_i32, %c0_i32_71 : i32
    %284 = arith.andi %21, %283 : i1
    %285 = arith.extui %284 : i1 to i32
    %286 = arith.sitofp %285 : i32 to f32
    %cst_72 = arith.constant 1.000000e+00 : f32
    %287 = arith.subf %cst_72, %286 : f32
    %288 = vector.broadcast %287 : f32 to vector<8x32xf32>
    %289 = arith.mulf %260, %288 : vector<8x32xf32>
    %290 = vector.broadcast %287 : f32 to vector<8x32xf32>
    %291 = arith.mulf %258, %290 : vector<8x32xf32>
    %c5_i32 = arith.constant 5 : i32
    %292 = arith.truncf %282 : vector<8x32xf32> to vector<8x32xbf16>
    %cst_73 = arith.constant dense<0.000000e+00> : vector<8x128xf32>
    %293 = tpu.matmul %292, %14, %cst_73 {dimension_numbers = #tpu.dot_dimension_numbers<[1], [0], [0], [1], [0, 0, 1, 1], [], []>} : vector<8x32xbf16>, vector<32x128xbf16>, vector<8x128xf32> -> vector<8x128xf32>
    %294 = arith.truncf %289 : vector<8x32xf32> to vector<8x32xbf16>
    %cst_74 = arith.constant dense<0.000000e+00> : vector<8x128xf32>
    %295 = tpu.matmul %294, %15, %cst_74 {dimension_numbers = #tpu.dot_dimension_numbers<[1], [0], [0], [1], [0, 0, 1, 1], [], []>} : vector<8x32xbf16>, vector<32x128xbf16>, vector<8x128xf32> -> vector<8x128xf32>
    %296 = arith.addf %293, %295 : vector<8x128xf32>
    %297 = vector.broadcast %16 : vector<1x128xf32> to vector<8x128xf32>
    %298 = arith.addf %296, %297 : vector<8x128xf32>
    %299 = vector.extract_strided_slice %298 {offsets = [0, 0], sizes = [8, 96], strides = [1, 1]} : vector<8x128xf32> to vector<8x96xf32>
    %300 = arith.negf %299 : vector<8x96xf32>
    %301 = math.exp %300 : vector<8x96xf32>
    %cst_75 = arith.constant 1.000000e+00 : f32
    %302 = vector.broadcast %cst_75 : f32 to vector<8x96xf32>
    %303 = arith.addf %302, %301 : vector<8x96xf32>
    %304 = arith.divf %302, %303 : vector<8x96xf32>
    %305 = vector.extract_strided_slice %304 {offsets = [0, 0], sizes = [8, 32], strides = [1, 1]} : vector<8x96xf32> to vector<8x32xf32>
    %306 = vector.extract_strided_slice %304 {offsets = [0, 32], sizes = [8, 32], strides = [1, 1]} : vector<8x96xf32> to vector<8x32xf32>
    %307 = vector.extract_strided_slice %304 {offsets = [0, 64], sizes = [8, 32], strides = [1, 1]} : vector<8x96xf32> to vector<8x32xf32>
    %308 = vector.extract_strided_slice %298 {offsets = [0, 96], sizes = [8, 32], strides = [1, 1]} : vector<8x128xf32> to vector<8x32xf32>
    %309 = math.tanh %308 : vector<8x32xf32>
    %310 = arith.mulf %306, %291 : vector<8x32xf32>
    %311 = arith.mulf %305, %309 : vector<8x32xf32>
    %312 = arith.addf %310, %311 : vector<8x32xf32>
    %313 = math.tanh %312 : vector<8x32xf32>
    %314 = arith.mulf %307, %313 : vector<8x32xf32>
    %315 = arith.index_cast %c5_i32 : i32 to index
    %c0_76 = arith.constant 0 : index
    %c0_77 = arith.constant 0 : index
    %316 = vector.load %arg12[%315, %c0_76, %c0_77] : memref<8x8x128xf32, #tpu.memory_space<vmem>>, vector<1x8x128xf32>
    %317 = vector.shape_cast %316 : vector<1x8x128xf32> to vector<8x128xf32>
    %318 = arith.truncf %282 : vector<8x32xf32> to vector<8x32xbf16>
    %cst_78 = arith.constant dense<0.000000e+00> : vector<8x128xf32>
    %319 = tpu.matmul %318, %13, %cst_78 {dimension_numbers = #tpu.dot_dimension_numbers<[1], [0], [0], [1], [0, 0, 1, 1], [], []>} : vector<8x32xbf16>, vector<32x128xbf16>, vector<8x128xf32> -> vector<8x128xf32>
    %320 = arith.addf %317, %319 : vector<8x128xf32>
    %321 = vector.extract_strided_slice %320 {offsets = [0, 0], sizes = [8, 96], strides = [1, 1]} : vector<8x128xf32> to vector<8x96xf32>
    %322 = arith.negf %321 : vector<8x96xf32>
    %323 = math.exp %322 : vector<8x96xf32>
    %cst_79 = arith.constant 1.000000e+00 : f32
    %324 = vector.broadcast %cst_79 : f32 to vector<8x96xf32>
    %325 = arith.addf %324, %323 : vector<8x96xf32>
    %326 = arith.divf %324, %325 : vector<8x96xf32>
    %327 = vector.extract_strided_slice %326 {offsets = [0, 0], sizes = [8, 32], strides = [1, 1]} : vector<8x96xf32> to vector<8x32xf32>
    %328 = vector.extract_strided_slice %326 {offsets = [0, 32], sizes = [8, 32], strides = [1, 1]} : vector<8x96xf32> to vector<8x32xf32>
    %329 = vector.extract_strided_slice %326 {offsets = [0, 64], sizes = [8, 32], strides = [1, 1]} : vector<8x96xf32> to vector<8x32xf32>
    %330 = vector.extract_strided_slice %320 {offsets = [0, 96], sizes = [8, 32], strides = [1, 1]} : vector<8x128xf32> to vector<8x32xf32>
    %331 = math.tanh %330 : vector<8x32xf32>
    %332 = arith.mulf %328, %280 : vector<8x32xf32>
    %333 = arith.mulf %327, %331 : vector<8x32xf32>
    %334 = arith.addf %332, %333 : vector<8x32xf32>
    %335 = math.tanh %334 : vector<8x32xf32>
    %336 = arith.mulf %329, %335 : vector<8x32xf32>
    %c0_i32_80 = arith.constant 0 : i32
    %337 = arith.cmpi eq, %c5_i32, %c0_i32_80 : i32
    %338 = arith.andi %21, %337 : i1
    %339 = arith.extui %338 : i1 to i32
    %340 = arith.sitofp %339 : i32 to f32
    %cst_81 = arith.constant 1.000000e+00 : f32
    %341 = arith.subf %cst_81, %340 : f32
    %342 = vector.broadcast %341 : f32 to vector<8x32xf32>
    %343 = arith.mulf %314, %342 : vector<8x32xf32>
    %344 = vector.broadcast %341 : f32 to vector<8x32xf32>
    %345 = arith.mulf %312, %344 : vector<8x32xf32>
    %c6_i32 = arith.constant 6 : i32
    %346 = arith.truncf %336 : vector<8x32xf32> to vector<8x32xbf16>
    %cst_82 = arith.constant dense<0.000000e+00> : vector<8x128xf32>
    %347 = tpu.matmul %346, %14, %cst_82 {dimension_numbers = #tpu.dot_dimension_numbers<[1], [0], [0], [1], [0, 0, 1, 1], [], []>} : vector<8x32xbf16>, vector<32x128xbf16>, vector<8x128xf32> -> vector<8x128xf32>
    %348 = arith.truncf %343 : vector<8x32xf32> to vector<8x32xbf16>
    %cst_83 = arith.constant dense<0.000000e+00> : vector<8x128xf32>
    %349 = tpu.matmul %348, %15, %cst_83 {dimension_numbers = #tpu.dot_dimension_numbers<[1], [0], [0], [1], [0, 0, 1, 1], [], []>} : vector<8x32xbf16>, vector<32x128xbf16>, vector<8x128xf32> -> vector<8x128xf32>
    %350 = arith.addf %347, %349 : vector<8x128xf32>
    %351 = vector.broadcast %16 : vector<1x128xf32> to vector<8x128xf32>
    %352 = arith.addf %350, %351 : vector<8x128xf32>
    %353 = vector.extract_strided_slice %352 {offsets = [0, 0], sizes = [8, 96], strides = [1, 1]} : vector<8x128xf32> to vector<8x96xf32>
    %354 = arith.negf %353 : vector<8x96xf32>
    %355 = math.exp %354 : vector<8x96xf32>
    %cst_84 = arith.constant 1.000000e+00 : f32
    %356 = vector.broadcast %cst_84 : f32 to vector<8x96xf32>
    %357 = arith.addf %356, %355 : vector<8x96xf32>
    %358 = arith.divf %356, %357 : vector<8x96xf32>
    %359 = vector.extract_strided_slice %358 {offsets = [0, 0], sizes = [8, 32], strides = [1, 1]} : vector<8x96xf32> to vector<8x32xf32>
    %360 = vector.extract_strided_slice %358 {offsets = [0, 32], sizes = [8, 32], strides = [1, 1]} : vector<8x96xf32> to vector<8x32xf32>
    %361 = vector.extract_strided_slice %358 {offsets = [0, 64], sizes = [8, 32], strides = [1, 1]} : vector<8x96xf32> to vector<8x32xf32>
    %362 = vector.extract_strided_slice %352 {offsets = [0, 96], sizes = [8, 32], strides = [1, 1]} : vector<8x128xf32> to vector<8x32xf32>
    %363 = math.tanh %362 : vector<8x32xf32>
    %364 = arith.mulf %360, %345 : vector<8x32xf32>
    %365 = arith.mulf %359, %363 : vector<8x32xf32>
    %366 = arith.addf %364, %365 : vector<8x32xf32>
    %367 = math.tanh %366 : vector<8x32xf32>
    %368 = arith.mulf %361, %367 : vector<8x32xf32>
    %369 = arith.index_cast %c6_i32 : i32 to index
    %c0_85 = arith.constant 0 : index
    %c0_86 = arith.constant 0 : index
    %370 = vector.load %arg12[%369, %c0_85, %c0_86] : memref<8x8x128xf32, #tpu.memory_space<vmem>>, vector<1x8x128xf32>
    %371 = vector.shape_cast %370 : vector<1x8x128xf32> to vector<8x128xf32>
    %372 = arith.truncf %336 : vector<8x32xf32> to vector<8x32xbf16>
    %cst_87 = arith.constant dense<0.000000e+00> : vector<8x128xf32>
    %373 = tpu.matmul %372, %13, %cst_87 {dimension_numbers = #tpu.dot_dimension_numbers<[1], [0], [0], [1], [0, 0, 1, 1], [], []>} : vector<8x32xbf16>, vector<32x128xbf16>, vector<8x128xf32> -> vector<8x128xf32>
    %374 = arith.addf %371, %373 : vector<8x128xf32>
    %375 = vector.extract_strided_slice %374 {offsets = [0, 0], sizes = [8, 96], strides = [1, 1]} : vector<8x128xf32> to vector<8x96xf32>
    %376 = arith.negf %375 : vector<8x96xf32>
    %377 = math.exp %376 : vector<8x96xf32>
    %cst_88 = arith.constant 1.000000e+00 : f32
    %378 = vector.broadcast %cst_88 : f32 to vector<8x96xf32>
    %379 = arith.addf %378, %377 : vector<8x96xf32>
    %380 = arith.divf %378, %379 : vector<8x96xf32>
    %381 = vector.extract_strided_slice %380 {offsets = [0, 0], sizes = [8, 32], strides = [1, 1]} : vector<8x96xf32> to vector<8x32xf32>
    %382 = vector.extract_strided_slice %380 {offsets = [0, 32], sizes = [8, 32], strides = [1, 1]} : vector<8x96xf32> to vector<8x32xf32>
    %383 = vector.extract_strided_slice %380 {offsets = [0, 64], sizes = [8, 32], strides = [1, 1]} : vector<8x96xf32> to vector<8x32xf32>
    %384 = vector.extract_strided_slice %374 {offsets = [0, 96], sizes = [8, 32], strides = [1, 1]} : vector<8x128xf32> to vector<8x32xf32>
    %385 = math.tanh %384 : vector<8x32xf32>
    %386 = arith.mulf %382, %334 : vector<8x32xf32>
    %387 = arith.mulf %381, %385 : vector<8x32xf32>
    %388 = arith.addf %386, %387 : vector<8x32xf32>
    %389 = math.tanh %388 : vector<8x32xf32>
    %390 = arith.mulf %383, %389 : vector<8x32xf32>
    %c0_i32_89 = arith.constant 0 : i32
    %391 = arith.cmpi eq, %c6_i32, %c0_i32_89 : i32
    %392 = arith.andi %21, %391 : i1
    %393 = arith.extui %392 : i1 to i32
    %394 = arith.sitofp %393 : i32 to f32
    %cst_90 = arith.constant 1.000000e+00 : f32
    %395 = arith.subf %cst_90, %394 : f32
    %396 = vector.broadcast %395 : f32 to vector<8x32xf32>
    %397 = arith.mulf %368, %396 : vector<8x32xf32>
    %398 = vector.broadcast %395 : f32 to vector<8x32xf32>
    %399 = arith.mulf %366, %398 : vector<8x32xf32>
    %c7_i32 = arith.constant 7 : i32
    %400 = arith.truncf %390 : vector<8x32xf32> to vector<8x32xbf16>
    %cst_91 = arith.constant dense<0.000000e+00> : vector<8x128xf32>
    %401 = tpu.matmul %400, %14, %cst_91 {dimension_numbers = #tpu.dot_dimension_numbers<[1], [0], [0], [1], [0, 0, 1, 1], [], []>} : vector<8x32xbf16>, vector<32x128xbf16>, vector<8x128xf32> -> vector<8x128xf32>
    %402 = arith.truncf %397 : vector<8x32xf32> to vector<8x32xbf16>
    %cst_92 = arith.constant dense<0.000000e+00> : vector<8x128xf32>
    %403 = tpu.matmul %402, %15, %cst_92 {dimension_numbers = #tpu.dot_dimension_numbers<[1], [0], [0], [1], [0, 0, 1, 1], [], []>} : vector<8x32xbf16>, vector<32x128xbf16>, vector<8x128xf32> -> vector<8x128xf32>
    %404 = arith.addf %401, %403 : vector<8x128xf32>
    %405 = vector.broadcast %16 : vector<1x128xf32> to vector<8x128xf32>
    %406 = arith.addf %404, %405 : vector<8x128xf32>
    %407 = vector.extract_strided_slice %406 {offsets = [0, 0], sizes = [8, 96], strides = [1, 1]} : vector<8x128xf32> to vector<8x96xf32>
    %408 = arith.negf %407 : vector<8x96xf32>
    %409 = math.exp %408 : vector<8x96xf32>
    %cst_93 = arith.constant 1.000000e+00 : f32
    %410 = vector.broadcast %cst_93 : f32 to vector<8x96xf32>
    %411 = arith.addf %410, %409 : vector<8x96xf32>
    %412 = arith.divf %410, %411 : vector<8x96xf32>
    %413 = vector.extract_strided_slice %412 {offsets = [0, 0], sizes = [8, 32], strides = [1, 1]} : vector<8x96xf32> to vector<8x32xf32>
    %414 = vector.extract_strided_slice %412 {offsets = [0, 32], sizes = [8, 32], strides = [1, 1]} : vector<8x96xf32> to vector<8x32xf32>
    %415 = vector.extract_strided_slice %412 {offsets = [0, 64], sizes = [8, 32], strides = [1, 1]} : vector<8x96xf32> to vector<8x32xf32>
    %416 = vector.extract_strided_slice %406 {offsets = [0, 96], sizes = [8, 32], strides = [1, 1]} : vector<8x128xf32> to vector<8x32xf32>
    %417 = math.tanh %416 : vector<8x32xf32>
    %418 = arith.mulf %414, %399 : vector<8x32xf32>
    %419 = arith.mulf %413, %417 : vector<8x32xf32>
    %420 = arith.addf %418, %419 : vector<8x32xf32>
    %421 = math.tanh %420 : vector<8x32xf32>
    %422 = arith.mulf %415, %421 : vector<8x32xf32>
    %423 = arith.index_cast %c7_i32 : i32 to index
    %c0_94 = arith.constant 0 : index
    %c0_95 = arith.constant 0 : index
    %424 = vector.load %arg12[%423, %c0_94, %c0_95] : memref<8x8x128xf32, #tpu.memory_space<vmem>>, vector<1x8x128xf32>
    %425 = vector.shape_cast %424 : vector<1x8x128xf32> to vector<8x128xf32>
    %426 = arith.truncf %390 : vector<8x32xf32> to vector<8x32xbf16>
    %cst_96 = arith.constant dense<0.000000e+00> : vector<8x128xf32>
    %427 = tpu.matmul %426, %13, %cst_96 {dimension_numbers = #tpu.dot_dimension_numbers<[1], [0], [0], [1], [0, 0, 1, 1], [], []>} : vector<8x32xbf16>, vector<32x128xbf16>, vector<8x128xf32> -> vector<8x128xf32>
    %428 = arith.addf %425, %427 : vector<8x128xf32>
    %429 = vector.extract_strided_slice %428 {offsets = [0, 0], sizes = [8, 96], strides = [1, 1]} : vector<8x128xf32> to vector<8x96xf32>
    %430 = arith.negf %429 : vector<8x96xf32>
    %431 = math.exp %430 : vector<8x96xf32>
    %cst_97 = arith.constant 1.000000e+00 : f32
    %432 = vector.broadcast %cst_97 : f32 to vector<8x96xf32>
    %433 = arith.addf %432, %431 : vector<8x96xf32>
    %434 = arith.divf %432, %433 : vector<8x96xf32>
    %435 = vector.extract_strided_slice %434 {offsets = [0, 0], sizes = [8, 32], strides = [1, 1]} : vector<8x96xf32> to vector<8x32xf32>
    %436 = vector.extract_strided_slice %434 {offsets = [0, 32], sizes = [8, 32], strides = [1, 1]} : vector<8x96xf32> to vector<8x32xf32>
    %437 = vector.extract_strided_slice %434 {offsets = [0, 64], sizes = [8, 32], strides = [1, 1]} : vector<8x96xf32> to vector<8x32xf32>
    %438 = vector.extract_strided_slice %428 {offsets = [0, 96], sizes = [8, 32], strides = [1, 1]} : vector<8x128xf32> to vector<8x32xf32>
    %439 = math.tanh %438 : vector<8x32xf32>
    %440 = arith.mulf %436, %388 : vector<8x32xf32>
    %441 = arith.mulf %435, %439 : vector<8x32xf32>
    %442 = arith.addf %440, %441 : vector<8x32xf32>
    %443 = math.tanh %442 : vector<8x32xf32>
    %444 = arith.mulf %437, %443 : vector<8x32xf32>
    %c0_i32_98 = arith.constant 0 : i32
    %445 = arith.cmpi eq, %c7_i32, %c0_i32_98 : i32
    %446 = arith.andi %21, %445 : i1
    %447 = arith.extui %446 : i1 to i32
    %448 = arith.sitofp %447 : i32 to f32
    %cst_99 = arith.constant 1.000000e+00 : f32
    %449 = arith.subf %cst_99, %448 : f32
    %450 = vector.broadcast %449 : f32 to vector<8x32xf32>
    %451 = arith.mulf %422, %450 : vector<8x32xf32>
    %452 = vector.broadcast %449 : f32 to vector<8x32xf32>
    %453 = arith.mulf %420, %452 : vector<8x32xf32>
    %c8_i32 = arith.constant 8 : i32
    %c0_100 = arith.constant 0 : index
    %c0_101 = arith.constant 0 : index
    %454 = vector.load %arg13[%c0_100, %c0_101] : memref<8x32xf32, #tpu.memory_space<vmem>>, vector<8x32xf32>
    tpu.vector_store %arg13[%c0_100, %c0_101], %444 {strides = array<i32>} : memref<8x32xf32, #tpu.memory_space<vmem>>, vector<8x32xf32>,
    %c0_102 = arith.constant 0 : index
    %c0_103 = arith.constant 0 : index
    %455 = vector.load %arg14[%c0_102, %c0_103] : memref<8x32xf32, #tpu.memory_space<vmem>>, vector<8x32xf32>
    tpu.vector_store %arg14[%c0_102, %c0_103], %442 {strides = array<i32>} : memref<8x32xf32, #tpu.memory_space<vmem>>, vector<8x32xf32>,
    %c0_104 = arith.constant 0 : index
    %c0_105 = arith.constant 0 : index
    %456 = vector.load %arg15[%c0_104, %c0_105] : memref<8x32xf32, #tpu.memory_space<vmem>>, vector<8x32xf32>
    tpu.vector_store %arg15[%c0_104, %c0_105], %451 {strides = array<i32>} : memref<8x32xf32, #tpu.memory_space<vmem>>, vector<8x32xf32>,
    %c0_106 = arith.constant 0 : index
    %c0_107 = arith.constant 0 : index
    %457 = vector.load %arg16[%c0_106, %c0_107] : memref<8x32xf32, #tpu.memory_space<vmem>>, vector<8x32xf32>
    tpu.vector_store %arg16[%c0_106, %c0_107], %453 {strides = array<i32>} : memref<8x32xf32, #tpu.memory_space<vmem>>, vector<8x32xf32>,
    %c0_i32_108 = arith.constant 0 : i32
    %458 = arith.cmpi eq, %arg1, %c0_i32_108 : i32
    %459 = arith.extui %458 : i1 to i32
    %c0_i32_109 = arith.constant 0 : i32
    %460 = arith.cmpi ne, %459, %c0_i32_109 : i32
    scf.if %460 {
      %461 = arith.truncf %444 : vector<8x32xf32> to vector<8x32xbf16>
      %cst_110 = arith.constant dense<0.000000e+00> : vector<8x128xf32>
      %462 = tpu.matmul %461, %14, %cst_110 {dimension_numbers = #tpu.dot_dimension_numbers<[1], [0], [0], [1], [0, 0, 1, 1], [], []>} : vector<8x32xbf16>, vector<32x128xbf16>, vector<8x128xf32> -> vector<8x128xf32>
      %463 = arith.truncf %451 : vector<8x32xf32> to vector<8x32xbf16>
      %cst_111 = arith.constant dense<0.000000e+00> : vector<8x128xf32>
      %464 = tpu.matmul %463, %15, %cst_111 {dimension_numbers = #tpu.dot_dimension_numbers<[1], [0], [0], [1], [0, 0, 1, 1], [], []>} : vector<8x32xbf16>, vector<32x128xbf16>, vector<8x128xf32> -> vector<8x128xf32>
      %465 = arith.addf %462, %464 : vector<8x128xf32>
      %466 = vector.broadcast %16 : vector<1x128xf32> to vector<8x128xf32>
      %467 = arith.addf %465, %466 : vector<8x128xf32>
      %468 = vector.extract_strided_slice %467 {offsets = [0, 0], sizes = [8, 96], strides = [1, 1]} : vector<8x128xf32> to vector<8x96xf32>
      %469 = arith.negf %468 : vector<8x96xf32>
      %470 = math.exp %469 : vector<8x96xf32>
      %cst_112 = arith.constant 1.000000e+00 : f32
      %471 = vector.broadcast %cst_112 : f32 to vector<8x96xf32>
      %472 = arith.addf %471, %470 : vector<8x96xf32>
      %473 = arith.divf %471, %472 : vector<8x96xf32>
      %474 = vector.extract_strided_slice %473 {offsets = [0, 0], sizes = [8, 32], strides = [1, 1]} : vector<8x96xf32> to vector<8x32xf32>
      %475 = vector.extract_strided_slice %473 {offsets = [0, 32], sizes = [8, 32], strides = [1, 1]} : vector<8x96xf32> to vector<8x32xf32>
      %476 = vector.extract_strided_slice %473 {offsets = [0, 64], sizes = [8, 32], strides = [1, 1]} : vector<8x96xf32> to vector<8x32xf32>
      %477 = vector.extract_strided_slice %467 {offsets = [0, 96], sizes = [8, 32], strides = [1, 1]} : vector<8x128xf32> to vector<8x32xf32>
      %478 = math.tanh %477 : vector<8x32xf32>
      %479 = arith.mulf %475, %453 : vector<8x32xf32>
      %480 = arith.mulf %474, %478 : vector<8x32xf32>
      %481 = arith.addf %479, %480 : vector<8x32xf32>
      %482 = math.tanh %481 : vector<8x32xf32>
      %483 = arith.mulf %476, %482 : vector<8x32xf32>
      %484 = arith.truncf %483 : vector<8x32xf32> to vector<8x32xbf16>
      %c0_113 = arith.constant 0 : index
      %c0_114 = arith.constant 0 : index
      %485 = vector.load %arg9[%c0_113, %c0_114] : memref<32x8xbf16, #tpu.memory_space<vmem>>, vector<32x8xbf16>
      %cst_115 = arith.constant dense<0.000000e+00> : vector<8x8xf32>
      %486 = tpu.matmul %484, %485, %cst_115 {dimension_numbers = #tpu.dot_dimension_numbers<[1], [0], [0], [1], [0, 0, 1, 1], [], []>} : vector<8x32xbf16>, vector<32x8xbf16>, vector<8x8xf32> -> vector<8x8xf32>
      %c0_116 = arith.constant 0 : index
      %c0_117 = arith.constant 0 : index
      %487 = vector.load %arg10[%c0_116, %c0_117] : memref<1x8xf32, #tpu.memory_space<vmem>>, vector<1x8xf32>
      %488 = vector.broadcast %487 : vector<1x8xf32> to vector<8x8xf32>
      %489 = arith.addf %486, %488 : vector<8x8xf32>
      %c0_118 = arith.constant 0 : index
      %c0_119 = arith.constant 0 : index
      %490 = vector.load %arg11[%c0_118, %c0_119] : memref<8x8xf32, #tpu.memory_space<vmem>>, vector<8x8xf32>
      tpu.vector_store %arg11[%c0_118, %c0_119], %489 {strides = array<i32>} : memref<8x8xf32, #tpu.memory_space<vmem>>, vector<8x8xf32>,
    } else {
    }
    return
  }
  func.func @transform_0(%arg0: i32, %arg1: i32) -> (i32, i32, i32) {
    %c0_i32 = arith.constant 0 : i32
    %c0_i32_0 = arith.constant 0 : i32
    return %arg1, %arg0, %c0_i32 : i32, i32, i32
  }
  func.func @transform_1(%arg0: i32, %arg1: i32) -> (i32, i32) {
    %c0_i32 = arith.constant 0 : i32
    %c0_i32_0 = arith.constant 0 : i32
    %c0_i32_1 = arith.constant 0 : i32
    return %c0_i32, %c0_i32_0 : i32, i32
  }
  func.func @transform_2(%arg0: i32, %arg1: i32) -> (i32, i32) {
    %c0_i32 = arith.constant 0 : i32
    %c0_i32_0 = arith.constant 0 : i32
    %c0_i32_1 = arith.constant 0 : i32
    return %c0_i32, %c0_i32_0 : i32, i32
  }
  func.func @transform_3(%arg0: i32, %arg1: i32) -> (i32, i32) {
    %c0_i32 = arith.constant 0 : i32
    %c0_i32_0 = arith.constant 0 : i32
    %c0_i32_1 = arith.constant 0 : i32
    return %c0_i32, %c0_i32_0 : i32, i32
  }
  func.func @transform_4(%arg0: i32, %arg1: i32) -> (i32, i32) {
    %c0_i32 = arith.constant 0 : i32
    %c0_i32_0 = arith.constant 0 : i32
    %c0_i32_1 = arith.constant 0 : i32
    return %c0_i32, %c0_i32_0 : i32, i32
  }
  func.func @transform_5(%arg0: i32, %arg1: i32) -> (i32, i32) {
    %c0_i32 = arith.constant 0 : i32
    %c0_i32_0 = arith.constant 0 : i32
    %c0_i32_1 = arith.constant 0 : i32
    return %c0_i32, %c0_i32_0 : i32, i32
  }
  func.func @transform_6(%arg0: i32, %arg1: i32) -> (i32, i32) {
    %c0_i32 = arith.constant 0 : i32
    %c0_i32_0 = arith.constant 0 : i32
    %c0_i32_1 = arith.constant 0 : i32
    return %c0_i32, %c0_i32_0 : i32, i32
  }
  func.func @transform_7(%arg0: i32, %arg1: i32) -> (i32, i32) {
    %c0_i32 = arith.constant 0 : i32
    %c0_i32_0 = arith.constant 0 : i32
    %c0_i32_1 = arith.constant 0 : i32
    return %c0_i32, %c0_i32_0 : i32, i32
  }
  func.func @transform_8(%arg0: i32, %arg1: i32) -> (i32, i32) {
    %c0_i32 = arith.constant 0 : i32
    %c0_i32_0 = arith.constant 0 : i32
    %c0_i32_1 = arith.constant 0 : i32
    return %c0_i32, %c0_i32_0 : i32, i32
  }
  func.func @transform_9(%arg0: i32, %arg1: i32) -> (i32, i32) {
    %c0_i32 = arith.constant 0 : i32
    %c0_i32_0 = arith.constant 0 : i32
    return %arg0, %c0_i32 : i32, i32
  }
}

</mosaic_0001>

<bundles_post_ra>
// kernel: tpu_custom_call.1
= control target key start
LH: loop header
LB: loop body
LE: loop exit
PB: predicated region body
PF: predicated region fallthrough
CT: control target
= control target key end

     0   :  { %14 = vsyncpa [#allocation8], 0  ;;  %s3164_s0 = inlined_call_operand.hbm [shape: f32[8,8,16], index: 0, kind: input, shape index: {}]   ;;  %s3165_s1 = inlined_call_operand.hbm [shape: bf16[16,128], index: 1, kind: input, shape index: {}]   ;;  %s3166_s2 = inlined_call_operand.vmem [shape: bf16[32,128], index: 2, kind: input, shape index: {}]   ;;  %s3167_s3 = inlined_call_operand.vmem [shape: f32[1,128], index: 3, kind: input, shape index: {}]   ;;  %s3168_s4 = inlined_call_operand.vmem [shape: bf16[32,128], index: 4, kind: input, shape index: {}]   ;;  %s3169_s5 = inlined_call_operand.hbm [shape: bf16[32,128], index: 5, kind: input, shape index: {}]   ;;  %s3170_s6 = inlined_call_operand.vmem [shape: f32[1,128], index: 6, kind: input, shape index: {}]   ;;  %s3171_s7 = inlined_call_operand.vmem [shape: bf16[32,8], index: 7, kind: input, shape index: {}]   ;;  %s3172_s8 = inlined_call_operand.vmem [shape: f32[1,8], index: 8, kind: input, shape index: {}]   ;;  %s3173_s9 = inlined_call_operand.hbm [shape: f32[8,8], index: 9, kind: output, shape index: {}]  }
   0x1   :  { %15 = vsyncpa [#allocation11], 0 }
   0x2   :  { %16 = vsyncpa [#allocation9], 0  ;;  %s2612_s30 = smov [#allocation10]   ;;  %s2518_s13 = scalar_lea.hbm %s3165_s1, 128 }
   0x3   :  { %s34_s10 = sshll.u32 %s2612_s30, 4  ;;  %p2519_p0 = scmp.ne.s32.totalorder %s3165_s1, %s2518_s13  ;;  %s35_s10 = int_to_ptr.vmem [resolvable:$true] %s34_s10 }
   0x4   :  { %p2522_p1 = scmp.lt.u32.totalorder %s2518_s13, %s3165_s1 }
   0x6   :  { %p2524_p2 = pnand %p2522_p1, %p2519_p0 }
   0x8   :  { %2527 = shalt.err (!%p2524_p2)
}
   0x9   :  { %s2528_s18 = scalar_lea.vmem %s35_s10, 128  ;;  %p2533_p4 = scmp.lt.s32.totalorder %s35_s10, %s35_s10 }
   0xa   :  { %p2529_p3 = scmp.ne.s32.totalorder %s35_s10, %s2528_s18  ;;  %p2534_p5 = scmp.lt.s32.totalorder %s2528_s18, %s2528_s18 }
   0xc   :  { %p2535_p6 = por %p2534_p5, %p2533_p4 }
   0xe   :  { %p2536_p7 = pnand %p2535_p6, %p2529_p3 }
  0x10   :  { %2539 = shalt.err (!%p2536_p7)
}
  0x11   :  { %s2613_s19 = smov 64   ;;  %s2614_s20 = smov 4  }
  0x12   :  { %40 = dma.hbm_to_vmem [thread:$0]  %s3165_s1, 128, %s35_s10, [#allocation11], %s2613_s19, %s2613_s19, %s2614_s20  }
  0x13   :  { %s2615_s23 = smov [#allocation7]   ;;  %s2540_s27 = scalar_lea.hbm %s3164_s0, 1024 }
  0x14   :  { %s22_s24 = sshll.u32 %s2615_s23, 4  ;;  %p2541_p8 = scmp.ne.s32.totalorder %s3164_s0, %s2540_s27  ;;  %s23_s24 = int_to_ptr.vmem [resolvable:$true] %s22_s24 }
  0x15   :  { %p2544_p9 = scmp.lt.u32.totalorder %s2540_s27, %s3164_s0 }
  0x17   :  { %p2546_p10 = pnand %p2544_p9, %p2541_p8 }
  0x19   :  { %2549 = shalt.err (!%p2546_p10)
}
  0x1a   :  { %s2550_s12 = scalar_lea.vmem %s23_s24, 1024  ;;  %p2555_p12 = scmp.lt.s32.totalorder %s23_s24, %s23_s24 }
  0x1b   :  { %p2551_p11 = scmp.ne.s32.totalorder %s23_s24, %s2550_s12  ;;  %p2556_p13 = scmp.lt.s32.totalorder %s2550_s12, %s2550_s12 }
  0x1d   :  { %p2557_p0 = por %p2556_p13, %p2555_p12 }
  0x1f   :  { %p2558_p1 = pnand %p2557_p0, %p2551_p11 }
  0x21   :  { %2561 = shalt.err (!%p2558_p1)
}
  0x22   :  { %s2616_s1 = smov 128   ;;  %s2617_s10 = smov 8  }
  0x23   :  { %28 = dma.hbm_to_vmem [thread:$0]  %s3164_s0, 1024, %s23_s24, [#allocation8], %s2616_s1, %s2616_s1, %s2617_s10  }
  0x24   :  { %s2618_s15 = smov [#allocation12]   ;;  %s2562_s21 = scalar_lea.hbm %s3169_s5, 256 }
  0x25   :  { %s52_s16 = sshll.u32 %s2618_s15, 4  ;;  %p2563_p2 = scmp.ne.s32.totalorder %s3169_s5, %s2562_s21  ;;  %s53_s16 = int_to_ptr.vmem [resolvable:$true] %s52_s16 }
  0x26   :  { %p2566_p3 = scmp.lt.u32.totalorder %s2562_s21, %s3169_s5 }
  0x28   :  { %p2568_p4 = pnand %p2566_p3, %p2563_p2 }
  0x2a   :  { %2571 = shalt.err (!%p2568_p4)
}
  0x2b   :  { %s2572_s27 = scalar_lea.vmem %s53_s16, 256  ;;  %p2577_p6 = scmp.lt.s32.totalorder %s53_s16, %s53_s16 }
  0x2c   :  { %p2573_p5 = scmp.ne.s32.totalorder %s53_s16, %s2572_s27  ;;  %p2578_p7 = scmp.lt.s32.totalorder %s2572_s27, %s2572_s27 }
  0x2e   :  { %p2579_p8 = por %p2578_p7, %p2577_p6 }
  0x30   :  { %p2580_p9 = pnand %p2579_p8, %p2573_p5 }
  0x32   :  { %2583 = shalt.err (!%p2580_p9)
}
  0x33   :  { %58 = dma.hbm_to_vmem [thread:$0]  %s3169_s5, 256, %s53_s16, [#allocation11], %s2613_s19, %s2613_s19, %s2614_s20  }
  0x34   :  { %2606 = dma.done.wait [#allocation8], 1024  }
  0x35   :  { %2607 = vsyncadd [#allocation8], 4294966272 }
  0x36   :  { %2608 = dma.done.wait [#allocation11], 384  }
  0x37   :  { %2609 = vsyncadd [#allocation11], 4294966912  ;;  %vm79_vm0 = vcmask 261120   ;;  %v2619_v0 = vmov 0.0   ;;  %vm2620_vm1 = vmmov 0   ;;  %v2366_v1 = vld [vmem:[#allocation10] sm:$0xff]  }
  0x38   :  { %2138 = vmatprep.subr.bf16.mxu1 %v2619_v0  ;;  %2142 = vmatprep.mubr.msk.bf16.mxu1 %vm2620_vm1, %v2619_v0  ;;  %82 = vst.msk [vmem:[#allocation5] sm:$0xff] %vm79_vm0, %v2619_v0  ;;  %80 = vst.msk [vmem:[#allocation3] sm:$0xff] %vm79_vm0, %v2619_v0  ;;  %v2727_v2 = vld [vmem:[#allocation12] sm:$0xff]   ;;  %v84_v3 = vld [vmem:[#allocation7] sm:$0xff]  ;;  %vm111_vm2 = vcmask 130048   ;;  %s2621_s10 = smov 32  }
  0x39   :  { %81 = vst.msk [vmem:[#allocation4] sm:$0xff] %vm79_vm0, %v2619_v0  ;;  %83 = vst.msk [vmem:[#allocation6] sm:$0xff] %vm79_vm0, %v2619_v0  ;;  %2128 = vmatprep.subr.bf16.mxu0 %v2366_v1  ;;  %v85_v4 = vld [vmem:[#allocation7 + $0x8] sm:$0xff]  ;;  %v86_v5 = vld [vmem:[#allocation7 + $0x10] sm:$0xff]  ;;  %2139 = vmatpush3.bf16.msra.mxu1 %v2727_v2  ;;  %s2622_s5 = smov 96   ;;  %vm1964_vm3 = vcmask 64512  }
  0x3a   :  { %2129 = vmatpush3.bf16.msra.mxu0 %v2366_v1  ;;  %v92_v6 = vpack.c.bf16 %v85_v4, %v84_v3  ;;  %v87_v7 = vld [vmem:[#allocation7 + $0x18] sm:$0xff]  ;;  %2140 = vmatprep.subr.bf16.mxu1 %v2619_v0  ;;  %v2731_v9 = vld [vmem:[#allocation12 + $0x8] sm:$0xff]   ;;  %v2738_v11 = vld [vmem:[%s3168_s4] sm:$0xff]  }
  0x3b   :  { %v93_v8 = vpack.c.bf16 %v87_v7, %v86_v5  ;;  %2154 = vmatprep.subr.bf16.mxu0 %v2619_v0  ;;  %v2744_v13 = vld [vmem:[%s3166_s2] sm:$0xff]   ;;  %v89_v15 = vld [vmem:[#allocation7 + $0x28] sm:$0xff]  ;;  %v90_v16 = vld [vmem:[#allocation7 + $0x30] sm:$0xff] }
  0x3c   :  { %2130 = vmatprep.mubr.msk.bf16.mxu0 %vm111_vm2, %v92_v6  ;;  %v88_v14 = vld [vmem:[#allocation7 + $0x20] sm:$0xff]  ;;  %v91_v17 = vld [vmem:[#allocation7 + $0x38] sm:$0xff]  ;;  %v2752_v19 = vld [vmem:[%s3168_s4 + $0x8] sm:$0xff]  }
  0x3d   :  { %2131 = vmatmul.mubr.msk.bf16.vlgmr.msra.gmra.mrb[0].mxu0 %vm111_vm2, %v93_v8  ;;  %2141 = vmatpush3.bf16.msra.mxu1 %v2731_v9  ;;  %v94_v18 = vpack.c.bf16 %v89_v15, %v88_v14  ;;  %v95_v21 = vpack.c.bf16 %v91_v17, %v90_v16  ;;  %v2760_v22 = vld [vmem:[%s3166_s2 + $0x8] sm:$0xff]   ;;  %v1982_v25 = vld [vmem:[%s3167_s3] ss:$0 sm:$0xff] }
  0x3e   :  { %2146 = vmatprep.subr.bf16.mxu1 %v2619_v0  ;;  %2155 = vmatpush3.bf16.msra.mxu0 %v2744_v13  ;;  %v2806_v44 = vld [vmem:[%s3170_s6] ss:$0 sm:$0xff] }
  0x3f   :  { %v212_v10 = vld [vmem:[#allocation5] sm:$0xff]  ;;  %v210_v20 = vld [vmem:[#allocation3] sm:$0xff]  ;;  %2156 = vmatprep.subr.bf16.mxu0 %v2619_v0  ;;  %2134 = vmatprep.mubr.msk.bf16.mxu0 %vm111_vm2, %v94_v18 }
  0x40   :  { %v215_v12 = vpack.c.bf16 %v212_v10, %v212_v10  ;;  %v213_v23 = vld [vmem:[#allocation6] sm:$0xff]  ;;  %v214_v24 = vpack.c.bf16 %v210_v20, %v210_v20  ;;  %v211_v60 = vld [vmem:[#allocation4] sm:$0xff] }
  0x41   :  { %342 = vrot.lane.b32.xlu1 %v213_v23, %s2621_s10 }
  0x42   :  { %2143 = vmatmul.mubr.msk.bf16.vlgmr.msra.gmra.mrb[0].mxu1 %vm79_vm0, %v215_v12  ;;  %2157 = vmatpush3.bf16.msra.mxu0 %v2760_v22 }
  0x43   :  { %2147 = vmatpush3.bf16.msra.mxu1 %v2738_v11  ;;  %2150 = vmatprep.mubr.msk.bf16.mxu1 %vm2620_vm1, %v2619_v0 }
  0x44   :  { %2148 = vmatprep.subr.bf16.mxu1 %v2619_v0  ;;  %2170 = vmatprep.subr.bf16.mxu0 %v2619_v0 }
  0x45   :  { %2135 = vmatmul.mubr.msk.bf16.gmra.mrb[4].mxu0 %vm111_vm2, %v95_v21 }
  0x46   :  { %2158 = vmatprep.mubr.msk.bf16.mxu0 %vm2620_vm1, %v2619_v0 }
  0x47   :  { %2149 = vmatpush3.bf16.msra.mxu1 %v2752_v19 }
  0x48   :  { %2162 = vmatprep.subr.bf16.mxu1 %v2619_v0 }
  0x4a   :  { %2151 = vmatmul.mubr.msk.bf16.vlgmr.msra.gmra.mrb[4].mxu1 %vm79_vm0, %v214_v24 }
  0x4b   :  { %2163 = vmatpush3.bf16.msra.mxu1 %v2727_v2  ;;  %2166 = vmatprep.mubr.msk.bf16.mxu1 %vm2620_vm1, %v2619_v0 }
  0x4c   :  { %2164 = vmatprep.subr.bf16.mxu1 %v2619_v0 }
  0x4d   :  { %2159 = vmatmul.mubr.msk.bf16.vlgmr.msra.gmra.mrb[8].mxu0 %vm79_vm0, %v214_v24 }
  0x4e   :  { %2171 = vmatpush3.bf16.msra.mxu0 %v2738_v11  ;;  %2174 = vmatprep.mubr.msk.bf16.mxu0 %vm2620_vm1, %v2619_v0 }
  0x4f   :  { %2165 = vmatpush3.bf16.msra.mxu1 %v2731_v9  ;;  %2172 = vmatprep.subr.bf16.mxu0 %v2619_v0 }
  0x50   :  { %2178 = vmatprep.subr.bf16.mxu1 %v2619_v0 }
  0x52   :  { %2173 = vmatpush3.bf16.msra.mxu0 %v2752_v19 }
  0x53   :  { %2186 = vmatprep.subr.bf16.mxu0 %v2619_v0 }
  0xb3   :  { %v343_v14 = vpop.permute.xlu1 %342 }
 0x110   :  { %v2132_v26 = vpop.f32.mrb[0].mxu0 }
 0x111   :  { %v2791_v27 = vadd.f32 %v2132_v26, %v1982_v25  ;;  %v158_v28 = vpop.f32.mrb[1].mxu0 }
 0x112   :  { %v2133_v29 = vpop.f32.mrb[2].mxu0  ;;  %v159_v50 = vadd.f32 %v1982_v25, %v158_v28 }
 0x113   :  { %v2793_v30 = vadd.f32 %v2133_v29, %v1982_v25  ;;  %v161_v31 = vpop.f32.mrb[3].mxu0 }
 0x114   :  { %v2795_v33 = vadd.f32 %v1982_v25, %v161_v31 }
 0x115   :  { %v266_v32 = vpop.f32.mrb[0].mxu1 }
 0x116   :  { %v2144_v34 = vpop.f32.mrb[1].mxu1 }
 0x117   :  { %v269_v35 = vpop.f32.mrb[2].mxu1 }
 0x118   :  { %v2145_v36 = vpop.f32.mrb[3].mxu1  ;;  %v2136_v37 = vpop.f32.mrb[4].mxu0 }
 0x119   :  { %v2797_v38 = vadd.f32 %v2136_v37, %v1982_v25  ;;  %v174_v39 = vpop.f32.mrb[5].mxu0 }
 0x11a   :  { %v2799_v40 = vadd.f32 %v1982_v25, %v174_v39  ;;  %v2137_v41 = vpop.f32.mrb[6].mxu0 }
 0x11b   :  { %v2801_v42 = vadd.f32 %v2137_v41, %v1982_v25  ;;  %v177_v43 = vpop.f32.mrb[7].mxu0 }
 0x11c   :  { %v2808_v46 = vadd.f32 %v1982_v25, %v177_v43 }
 0x11d   :  { %v321_v45 = vpop.f32.mrb[4].mxu1 }
 0x11e   :  { %v322_v47 = vadd.f32 %v321_v45, %v266_v32  ;;  %v2152_v48 = vpop.f32.mrb[5].mxu1 }
 0x11f   :  { %v324_v49 = vpop.f32.mrb[6].mxu1 }
 0x120   :  { %v333_v51 = vadd.f32 %v2806_v44, %v322_v47  ;;  %v2153_v52 = vpop.f32.mrb[7].mxu1  ;;  %v409_v53 = vpop.f32.mrb[8].mxu0 }
 0x121   :  { %v415_v54 = vadd.f32 %v409_v53, %v159_v50  ;;  %v2160_v55 = vpop.f32.mrb[9].mxu0 }
 0x122   :  { %2375 = vtanh.f32 %v333_v51  ;;  %v412_v56 = vpop.f32.mrb[10].mxu0  ;;  %v1995_v61 = vmul.f32 -1.442695, %v333_v51 }
 0x123   :  { %v2161_v57 = vpop.f32.mrb[11].mxu0  ;;  %2377 = vtanh.f32 %v415_v54  ;;  %v1999_v62 = vmul.f32 -1.442695, %v415_v54 }
 0x124   :  { %2379 = vpow2.f32 %v1995_v61 }
 0x125   :  { %2381 = vpow2.f32 %v1999_v62 }
 0x12c   :  { %v2376_v58 = vpop.eup %2375 }
 0x12d   :  { %347 = vrot.lane.b32.xlu0 %v2376_v58, %s2621_s10  ;;  %v2378_v59 = vpop.eup %2377 }
 0x12e   :  { %v2380_v63 = vpop.eup %2379 }
 0x12f   :  { %v337_v1 = vadd.f32 1.0, %v2380_v63  ;;  %v2382_v3 = vpop.eup %2381 }
 0x130   :  { %v419_v4 = vadd.f32 1.0, %v2382_v3 }
 0x131   :  { %429 = vrot.lane.b32.xlu0 %v2378_v59, %s2621_s10  ;;  %2383 = vrcp.f32 %v337_v1 }
 0x132   :  { %2385 = vrcp.f32 %v419_v4 }
 0x135   :  { %424 = vrot.lane.b32.xlu0 %v211_v60, %s2621_s10 }
 0x13b   :  { %v2384_v5 = vpop.eup %2383 }
 0x13c   :  { %v2386_v8 = vpop.eup %2385  ;;  %v345_v15 = vmul.f32 %v2384_v5, %v343_v14 }
 0x19f   :  { %v348_v6 = vpop.permute.xlu0 %347 }
 0x1a0   :  { %v350_v7 = vmul.f32 %v2384_v5, %v348_v6 }
 0x1a2   :  { %352 = vrot.lane.b32.xlu1 %v350_v7, %s2621_s10 }
 0x1a3   :  { %v430_v10 = vpop.permute.xlu0 %429 }
 0x1a4   :  { %v432_v12 = vmul.f32 %v2386_v8, %v430_v10 }
 0x1a6   :  { %434 = vrot.lane.b32.xlu1 %v432_v12, %s2621_s10 }
 0x1a7   :  { %v425_v16 = vpop.permute.xlu0 %424 }
 0x1a8   :  { %v427_v20 = vmul.f32 %v2386_v8, %v425_v16 }
 0x214   :  { %v353_v17 = vpop.permute.xlu1 %352 }
 0x215   :  { %v2816_v18 = vadd.f32 %v353_v17, %v345_v15 }
 0x217   :  { %2387 = vtanh.f32 %v2816_v18  ;;  %v449_v10 = vmul.f32 0.0, %v2816_v18 }
 0x218   :  { %v435_v21 = vpop.permute.xlu1 %434 }
 0x219   :  { %v2819_v23 = vadd.f32 %v435_v21, %v427_v20 }
 0x21b   :  { %2389 = vtanh.f32 %v2819_v23 }
 0x221   :  { %v2388_v24 = vpop.eup %2387 }
 0x222   :  { %358 = vrot.lane.b32.xlu0 %v2388_v24, %s2621_s10 }
 0x225   :  { %v2390_v25 = vpop.eup %2389 }
 0x226   :  { %440 = vrot.lane.b32.xlu1 %v2390_v25, %s2621_s10 }
 0x294   :  { %v359_v26 = vpop.permute.xlu0 %358 }
 0x295   :  { %v361_v28 = vmul.f32 %v2384_v5, %v359_v26 }
 0x297   :  { %v448_v29 = vmul.f32 0.0, %v361_v28 }
 0x298   :  { %v441_v31 = vpop.permute.xlu1 %440 }
 0x299   :  { %v443_v32 = vmul.f32 %v2386_v8, %v441_v31  ;;  %v451_v34 = vpack.c.bf16 %v448_v29, %v448_v29 }
 0x29b   :  { %v450_v35 = vpack.c.bf16 %v443_v32, %v443_v32  ;;  %453 = vrot.lane.b32.xlu0 %v451_v34, %s2613_s19 }
 0x29d   :  { %499 = vrot.lane.b32.xlu1 %v450_v35, %s2613_s19 }
 0x30d   :  { %v454_v36 = vpop.permute.xlu0 %453 }
 0x30e   :  { %2167 = vmatmul.mubr.msk.bf16.vlgmr.msra.gmra.mrb[8].mxu1 %vm79_vm0, %v454_v36 }
 0x30f   :  { %v500_v37 = vpop.permute.xlu1 %499  ;;  %2179 = vmatpush3.bf16.msra.mxu1 %v2744_v13  ;;  %2182 = vmatprep.mubr.msk.bf16.mxu1 %vm2620_vm1, %v2619_v0 }
 0x310   :  { %2175 = vmatmul.mubr.msk.bf16.vlgmr.msra.gmra.mrb[12].mxu0 %vm79_vm0, %v500_v37  ;;  %2180 = vmatprep.subr.bf16.mxu1 %v2619_v0 }
 0x311   :  { %2187 = vmatpush3.bf16.msra.mxu0 %v2727_v2  ;;  %2190 = vmatprep.mubr.msk.bf16.mxu0 %vm2620_vm1, %v2619_v0 }
 0x312   :  { %2188 = vmatprep.subr.bf16.mxu0 %v2619_v0 }
 0x313   :  { %2181 = vmatpush3.bf16.msra.mxu1 %v2760_v22 }
 0x314   :  { %2194 = vmatprep.subr.bf16.mxu1 %v2619_v0 }
 0x315   :  { %2189 = vmatpush3.bf16.msra.mxu0 %v2731_v9 }
 0x316   :  { %2183 = vmatmul.mubr.msk.bf16.vlgmr.msra.gmra.mrb[12].mxu1 %vm79_vm0, %v500_v37  ;;  %2202 = vmatprep.subr.bf16.mxu0 %v2619_v0 }
 0x317   :  { %2195 = vmatpush3.bf16.msra.mxu1 %v2738_v11  ;;  %2198 = vmatprep.mubr.msk.bf16.mxu1 %vm2620_vm1, %v2619_v0 }
 0x318   :  { %2196 = vmatprep.subr.bf16.mxu1 %v2619_v0 }
 0x31b   :  { %2197 = vmatpush3.bf16.msra.mxu1 %v2752_v19 }
 0x31c   :  { %2210 = vmatprep.subr.bf16.mxu1 %v2619_v0 }
 0x3e1   :  { %v492_v39 = vpop.f32.mrb[8].mxu1 }
 0x3e2   :  { %v2168_v41 = vpop.f32.mrb[9].mxu1 }
 0x3e3   :  { %v495_v43 = vpop.f32.mrb[10].mxu1  ;;  %v538_v45 = vpop.f32.mrb[12].mxu0 }
 0x3e4   :  { %v539_v47 = vadd.f32 %v538_v45, %v492_v39  ;;  %v2169_v48 = vpop.f32.mrb[11].mxu1  ;;  %v2176_v49 = vpop.f32.mrb[13].mxu0 }
 0x3e5   :  { %v541_v50 = vpop.f32.mrb[14].mxu0 }
 0x3e6   :  { %v544_v51 = vadd.f32 %v2806_v44, %v539_v47  ;;  %v2177_v52 = vpop.f32.mrb[15].mxu0 }
 0x3e8   :  { %2391 = vtanh.f32 %v544_v51  ;;  %v2002_v60 = vmul.f32 -1.442695, %v544_v51 }
 0x3e9   :  { %v605_v53 = vpop.f32.mrb[12].mxu1 }
 0x3ea   :  { %v611_v54 = vadd.f32 %v605_v53, %v2795_v33  ;;  %v2184_v55 = vpop.f32.mrb[13].mxu1 }
 0x3eb   :  { %v608_v56 = vpop.f32.mrb[14].mxu1 }
 0x3ec   :  { %2393 = vtanh.f32 %v611_v54  ;;  %v2185_v57 = vpop.f32.mrb[15].mxu1  ;;  %v2004_v61 = vmul.f32 -1.442695, %v611_v54 }
 0x3ed   :  { %2395 = vpow2.f32 %v2002_v60 }
 0x3ee   :  { %2397 = vpow2.f32 %v2004_v61 }
 0x3f2   :  { %v2392_v58 = vpop.eup %2391 }
 0x3f3   :  { %554 = vrot.lane.b32.xlu0 %v2392_v58, %s2621_s10 }
 0x3f6   :  { %v2394_v59 = vpop.eup %2393 }
 0x3f7   :  { %621 = vrot.lane.b32.xlu1 %v2394_v59, %s2621_s10  ;;  %v2396_v62 = vpop.eup %2395 }
 0x3f8   :  { %v548_v63 = vadd.f32 1.0, %v2396_v62  ;;  %v2398_v1 = vpop.eup %2397 }
 0x3f9   :  { %v615_v3 = vadd.f32 1.0, %v2398_v1 }
 0x3fa   :  { %2399 = vrcp.f32 %v548_v63 }
 0x3fb   :  { %2401 = vrcp.f32 %v615_v3 }
 0x404   :  { %v2400_v33 = vpop.eup %2399 }
 0x405   :  { %v2402_v6 = vpop.eup %2401  ;;  %v552_v12 = vmul.f32 %v2400_v33, %v449_v10 }
 0x406   :  { %v619_v16 = vmul.f32 %v2402_v6, %v2819_v23 }
 0x465   :  { %v555_v4 = vpop.permute.xlu0 %554 }
 0x466   :  { %v557_v5 = vmul.f32 %v2400_v33, %v555_v4 }
 0x468   :  { %559 = vrot.lane.b32.xlu0 %v557_v5, %s2621_s10 }
 0x469   :  { %v622_v7 = vpop.permute.xlu1 %621 }
 0x46a   :  { %v624_v8 = vmul.f32 %v2402_v6, %v622_v7 }
 0x46c   :  { %626 = vrot.lane.b32.xlu1 %v624_v8, %s2621_s10 }
 0x4da   :  { %v560_v14 = vpop.permute.xlu0 %559 }
 0x4db   :  { %v2854_v15 = vadd.f32 %v560_v14, %v552_v12 }
 0x4dd   :  { %2403 = vtanh.f32 %v2854_v15 }
 0x4de   :  { %v627_v17 = vpop.permute.xlu1 %626 }
 0x4df   :  { %v2858_v20 = vadd.f32 %v627_v17, %v619_v16 }
 0x4e1   :  { %2405 = vtanh.f32 %v2858_v20 }
 0x4e7   :  { %v2404_v21 = vpop.eup %2403 }
 0x4e8   :  { %565 = vrot.lane.b32.xlu0 %v2404_v21, %s2621_s10 }
 0x4eb   :  { %v2406_v24 = vpop.eup %2405 }
 0x4ec   :  { %632 = vrot.lane.b32.xlu1 %v2406_v24, %s2621_s10 }
 0x55a   :  { %v566_v18 = vpop.permute.xlu0 %565 }
 0x55b   :  { %v568_v25 = vmul.f32 %v2400_v33, %v566_v18 }
 0x55d   :  { %v637_v26 = vpack.c.bf16 %v568_v25, %v568_v25 }
 0x55e   :  { %v633_v28 = vpop.permute.xlu1 %632 }
 0x55f   :  { %v635_v29 = vmul.f32 %v2402_v6, %v633_v28  ;;  %639 = vrot.lane.b32.xlu0 %v637_v26, %s2613_s19 }
 0x561   :  { %v636_v31 = vpack.c.bf16 %v635_v29, %v635_v29 }
 0x563   :  { %685 = vrot.lane.b32.xlu1 %v636_v31, %s2613_s19 }
 0x5d1   :  { %v640_v23 = vpop.permute.xlu0 %639 }
 0x5d2   :  { %2191 = vmatmul.mubr.msk.bf16.vlgmr.msra.gmra.mrb[16].mxu0 %vm79_vm0, %v640_v23 }
 0x5d3   :  { %2203 = vmatpush3.bf16.msra.mxu0 %v2744_v13  ;;  %2206 = vmatprep.mubr.msk.bf16.mxu0 %vm2620_vm1, %v2619_v0 }
 0x5d4   :  { %2204 = vmatprep.subr.bf16.mxu0 %v2619_v0 }
 0x5d5   :  { %v686_v32 = vpop.permute.xlu1 %685 }
 0x5d6   :  { %2199 = vmatmul.mubr.msk.bf16.vlgmr.msra.gmra.mrb[16].mxu1 %vm79_vm0, %v686_v32 }
 0x5d7   :  { %2205 = vmatpush3.bf16.msra.mxu0 %v2760_v22  ;;  %2211 = vmatpush3.bf16.msra.mxu1 %v2727_v2 }
 0x5d8   :  { %2218 = vmatprep.subr.bf16.mxu0 %v2619_v0  ;;  %2212 = vmatprep.subr.bf16.mxu1 %v2619_v0 }
 0x5d9   :  { %2214 = vmatprep.mubr.msk.bf16.mxu1 %vm2620_vm1, %v2619_v0 }
 0x5da   :  { %2207 = vmatmul.mubr.msk.bf16.vlgmr.msra.gmra.mrb[20].mxu0 %vm79_vm0, %v686_v32 }
 0x5db   :  { %2219 = vmatpush3.bf16.msra.mxu0 %v2738_v11  ;;  %2213 = vmatpush3.bf16.msra.mxu1 %v2731_v9 }
 0x5dc   :  { %2220 = vmatprep.subr.bf16.mxu0 %v2619_v0  ;;  %2226 = vmatprep.subr.bf16.mxu1 %v2619_v0 }
 0x5dd   :  { %2222 = vmatprep.mubr.msk.bf16.mxu0 %vm2620_vm1, %v2619_v0 }
 0x5df   :  { %2221 = vmatpush3.bf16.msra.mxu0 %v2752_v19 }
 0x5e0   :  { %2234 = vmatprep.subr.bf16.mxu0 %v2619_v0 }
 0x6a5   :  { %v678_v34 = vpop.f32.mrb[16].mxu0 }
 0x6a6   :  { %v2192_v35 = vpop.f32.mrb[17].mxu0 }
 0x6a7   :  { %v681_v36 = vpop.f32.mrb[18].mxu0 }
 0x6a8   :  { %v2193_v37 = vpop.f32.mrb[19].mxu0 }
 0x6a9   :  { %v724_v39 = vpop.f32.mrb[16].mxu1 }
 0x6aa   :  { %v725_v41 = vadd.f32 %v724_v39, %v678_v34  ;;  %v2200_v43 = vpop.f32.mrb[17].mxu1 }
 0x6ab   :  { %v727_v45 = vpop.f32.mrb[18].mxu1 }
 0x6ac   :  { %v730_v47 = vadd.f32 %v2806_v44, %v725_v41  ;;  %v2201_v48 = vpop.f32.mrb[19].mxu1 }
 0x6ad   :  { %v791_v49 = vpop.f32.mrb[20].mxu0 }
 0x6ae   :  { %2407 = vtanh.f32 %v730_v47  ;;  %v797_v50 = vadd.f32 %v791_v49, %v2791_v27  ;;  %v2208_v51 = vpop.f32.mrb[21].mxu0  ;;  %v2007_v56 = vmul.f32 -1.442695, %v730_v47 }
 0x6af   :  { %v794_v52 = vpop.f32.mrb[22].mxu0 }
 0x6b0   :  { %v2209_v53 = vpop.f32.mrb[23].mxu0  ;;  %2409 = vtanh.f32 %v797_v50  ;;  %v2009_v57 = vmul.f32 -1.442695, %v797_v50 }
 0x6b1   :  { %2411 = vpow2.f32 %v2007_v56 }
 0x6b2   :  { %2413 = vpow2.f32 %v2009_v57 }
 0x6b8   :  { %v2408_v54 = vpop.eup %2407 }
 0x6b9   :  { %740 = vrot.lane.b32.xlu0 %v2408_v54, %s2621_s10 }
 0x6ba   :  { %v2410_v55 = vpop.eup %2409 }
 0x6bb   :  { %807 = vrot.lane.b32.xlu1 %v2410_v55, %s2621_s10  ;;  %v2412_v58 = vpop.eup %2411 }
 0x6bc   :  { %v2414_v59 = vpop.eup %2413  ;;  %v734_v60 = vadd.f32 1.0, %v2412_v58 }
 0x6bd   :  { %v801_v61 = vadd.f32 1.0, %v2414_v59 }
 0x6be   :  { %2415 = vrcp.f32 %v734_v60 }
 0x6bf   :  { %2417 = vrcp.f32 %v801_v61 }
 0x6c8   :  { %v2416_v27 = vpop.eup %2415 }
 0x6c9   :  { %v2418_v1 = vpop.eup %2417  ;;  %v738_v4 = vmul.f32 %v2416_v27, %v2854_v15 }
 0x6ca   :  { %v805_v7 = vmul.f32 %v2418_v1, %v2858_v20 }
 0x72b   :  { %v741_v62 = vpop.permute.xlu0 %740 }
 0x72c   :  { %v743_v63 = vmul.f32 %v2416_v27, %v741_v62 }
 0x72d   :  { %v808_v3 = vpop.permute.xlu1 %807 }
 0x72e   :  { %745 = vrot.lane.b32.xlu0 %v743_v63, %s2621_s10  ;;  %v810_v33 = vmul.f32 %v2418_v1, %v808_v3 }
 0x730   :  { %812 = vrot.lane.b32.xlu1 %v810_v33, %s2621_s10 }
 0x7a0   :  { %v746_v5 = vpop.permute.xlu0 %745 }
 0x7a1   :  { %v2893_v6 = vadd.f32 %v746_v5, %v738_v4 }
 0x7a2   :  { %v813_v8 = vpop.permute.xlu1 %812 }
 0x7a3   :  { %2419 = vtanh.f32 %v2893_v6  ;;  %v2897_v10 = vadd.f32 %v813_v8, %v805_v7 }
 0x7a5   :  { %2421 = vtanh.f32 %v2897_v10 }
 0x7ad   :  { %v2420_v12 = vpop.eup %2419 }
 0x7ae   :  { %751 = vrot.lane.b32.xlu0 %v2420_v12, %s2621_s10 }
 0x7af   :  { %v2422_v14 = vpop.eup %2421 }
 0x7b0   :  { %818 = vrot.lane.b32.xlu1 %v2422_v14, %s2621_s10 }
 0x820   :  { %v752_v16 = vpop.permute.xlu0 %751 }
 0x821   :  { %v754_v15 = vmul.f32 %v2416_v27, %v752_v16 }
 0x822   :  { %v819_v21 = vpop.permute.xlu1 %818 }
 0x823   :  { %v823_v17 = vpack.c.bf16 %v754_v15, %v754_v15  ;;  %v821_v24 = vmul.f32 %v2418_v1, %v819_v21 }
 0x825   :  { %825 = vrot.lane.b32.xlu0 %v823_v17, %s2613_s19  ;;  %v822_v20 = vpack.c.bf16 %v821_v24, %v821_v24 }
 0x827   :  { %871 = vrot.lane.b32.xlu1 %v822_v20, %s2613_s19 }
 0x897   :  { %v826_v18 = vpop.permute.xlu0 %825 }
 0x898   :  { %2215 = vmatmul.mubr.msk.bf16.vlgmr.msra.gmra.mrb[20].mxu1 %vm79_vm0, %v826_v18 }
 0x899   :  { %2227 = vmatpush3.bf16.msra.mxu1 %v2744_v13  ;;  %2230 = vmatprep.mubr.msk.bf16.mxu1 %vm2620_vm1, %v2619_v0  ;;  %v872_v25 = vpop.permute.xlu1 %871 }
 0x89a   :  { %2228 = vmatprep.subr.bf16.mxu1 %v2619_v0  ;;  %2223 = vmatmul.mubr.msk.bf16.vlgmr.msra.gmra.mrb[24].mxu0 %vm79_vm0, %v872_v25 }
 0x89b   :  { %2235 = vmatpush3.bf16.msra.mxu0 %v2727_v2  ;;  %2238 = vmatprep.mubr.msk.bf16.mxu0 %vm2620_vm1, %v2619_v0 }
 0x89c   :  { %2236 = vmatprep.subr.bf16.mxu0 %v2619_v0 }
 0x89d   :  { %2229 = vmatpush3.bf16.msra.mxu1 %v2760_v22 }
 0x89e   :  { %2242 = vmatprep.subr.bf16.mxu1 %v2619_v0 }
 0x89f   :  { %2237 = vmatpush3.bf16.msra.mxu0 %v2731_v9 }
 0x8a0   :  { %2231 = vmatmul.mubr.msk.bf16.vlgmr.msra.gmra.mrb[24].mxu1 %vm79_vm0, %v872_v25  ;;  %2250 = vmatprep.subr.bf16.mxu0 %v2619_v0 }
 0x8a1   :  { %2243 = vmatpush3.bf16.msra.mxu1 %v2738_v11  ;;  %2246 = vmatprep.mubr.msk.bf16.mxu1 %vm2620_vm1, %v2619_v0 }
 0x8a2   :  { %2244 = vmatprep.subr.bf16.mxu1 %v2619_v0 }
 0x8a5   :  { %2245 = vmatpush3.bf16.msra.mxu1 %v2752_v19 }
 0x8a6   :  { %2258 = vmatprep.subr.bf16.mxu1 %v2619_v0 }
 0x96b   :  { %v864_v26 = vpop.f32.mrb[20].mxu1 }
 0x96c   :  { %v2216_v28 = vpop.f32.mrb[21].mxu1 }
 0x96d   :  { %v867_v29 = vpop.f32.mrb[22].mxu1  ;;  %v910_v31 = vpop.f32.mrb[24].mxu0 }
 0x96e   :  { %v2217_v23 = vpop.f32.mrb[23].mxu1  ;;  %v911_v32 = vadd.f32 %v910_v31, %v864_v26  ;;  %v2224_v34 = vpop.f32.mrb[25].mxu0 }
 0x96f   :  { %v913_v35 = vpop.f32.mrb[26].mxu0 }
 0x970   :  { %v916_v36 = vadd.f32 %v2806_v44, %v911_v32  ;;  %v2225_v37 = vpop.f32.mrb[27].mxu0 }
 0x972   :  { %2423 = vtanh.f32 %v916_v36  ;;  %v2012_v50 = vmul.f32 -1.442695, %v916_v36 }
 0x973   :  { %v977_v39 = vpop.f32.mrb[24].mxu1 }
 0x974   :  { %v983_v41 = vadd.f32 %v977_v39, %v2793_v30  ;;  %v2232_v43 = vpop.f32.mrb[25].mxu1 }
 0x975   :  { %v980_v45 = vpop.f32.mrb[26].mxu1 }
 0x976   :  { %2425 = vtanh.f32 %v983_v41  ;;  %v2233_v47 = vpop.f32.mrb[27].mxu1  ;;  %v2014_v51 = vmul.f32 -1.442695, %v983_v41 }
 0x977   :  { %2427 = vpow2.f32 %v2012_v50 }
 0x978   :  { %2429 = vpow2.f32 %v2014_v51 }
 0x97c   :  { %v2424_v48 = vpop.eup %2423 }
 0x97d   :  { %926 = vrot.lane.b32.xlu0 %v2424_v48, %s2621_s10 }
 0x980   :  { %v2426_v49 = vpop.eup %2425 }
 0x981   :  { %993 = vrot.lane.b32.xlu1 %v2426_v49, %s2621_s10  ;;  %v2428_v52 = vpop.eup %2427 }
 0x982   :  { %v2430_v53 = vpop.eup %2429  ;;  %v920_v54 = vadd.f32 1.0, %v2428_v52 }
 0x983   :  { %v987_v55 = vadd.f32 1.0, %v2430_v53 }
 0x984   :  { %2431 = vrcp.f32 %v920_v54 }
 0x985   :  { %2433 = vrcp.f32 %v987_v55 }
 0x98e   :  { %v2432_v30 = vpop.eup %2431 }
 0x98f   :  { %v2434_v58 = vpop.eup %2433  ;;  %v924_v61 = vmul.f32 %v2432_v30, %v2893_v6 }
 0x990   :  { %v991_v63 = vmul.f32 %v2434_v58, %v2897_v10 }
 0x9ef   :  { %v927_v56 = vpop.permute.xlu0 %926 }
 0x9f0   :  { %v929_v57 = vmul.f32 %v2432_v30, %v927_v56 }
 0x9f2   :  { %931 = vrot.lane.b32.xlu0 %v929_v57, %s2621_s10 }
 0x9f3   :  { %v994_v59 = vpop.permute.xlu1 %993 }
 0x9f4   :  { %v996_v60 = vmul.f32 %v2434_v58, %v994_v59 }
 0x9f6   :  { %998 = vrot.lane.b32.xlu1 %v996_v60, %s2621_s10 }
 0xa64   :  { %v932_v27 = vpop.permute.xlu0 %931 }
 0xa65   :  { %v2932_v62 = vadd.f32 %v932_v27, %v924_v61 }
 0xa67   :  { %2435 = vtanh.f32 %v2932_v62 }
 0xa68   :  { %v999_v1 = vpop.permute.xlu1 %998 }
 0xa69   :  { %v2936_v3 = vadd.f32 %v999_v1, %v991_v63 }
 0xa6b   :  { %2437 = vtanh.f32 %v2936_v3 }
 0xa71   :  { %v2436_v33 = vpop.eup %2435 }
 0xa72   :  { %937 = vrot.lane.b32.xlu0 %v2436_v33, %s2621_s10 }
 0xa75   :  { %v2438_v4 = vpop.eup %2437 }
 0xa76   :  { %1004 = vrot.lane.b32.xlu1 %v2438_v4, %s2621_s10 }
 0xae4   :  { %v938_v5 = vpop.permute.xlu0 %937 }
 0xae5   :  { %v940_v6 = vmul.f32 %v2432_v30, %v938_v5 }
 0xae7   :  { %v1009_v7 = vpack.c.bf16 %v940_v6, %v940_v6 }
 0xae8   :  { %v1005_v8 = vpop.permute.xlu1 %1004 }
 0xae9   :  { %v1007_v12 = vmul.f32 %v2434_v58, %v1005_v8  ;;  %1011 = vrot.lane.b32.xlu0 %v1009_v7, %s2613_s19 }
 0xaeb   :  { %v1008_v10 = vpack.c.bf16 %v1007_v12, %v1007_v12 }
 0xaed   :  { %1057 = vrot.lane.b32.xlu1 %v1008_v10, %s2613_s19 }
 0xb5b   :  { %v1012_v14 = vpop.permute.xlu0 %1011 }
 0xb5c   :  { %2239 = vmatmul.mubr.msk.bf16.vlgmr.msra.gmra.mrb[28].mxu0 %vm79_vm0, %v1012_v14 }
 0xb5d   :  { %2251 = vmatpush3.bf16.msra.mxu0 %v2744_v13  ;;  %2254 = vmatprep.mubr.msk.bf16.mxu0 %vm2620_vm1, %v2619_v0 }
 0xb5e   :  { %2252 = vmatprep.subr.bf16.mxu0 %v2619_v0 }
 0xb5f   :  { %v1058_v16 = vpop.permute.xlu1 %1057 }
 0xb60   :  { %2247 = vmatmul.mubr.msk.bf16.vlgmr.msra.gmra.mrb[28].mxu1 %vm79_vm0, %v1058_v16 }
 0xb61   :  { %2259 = vmatpush3.bf16.msra.mxu1 %v2727_v2  ;;  %2262 = vmatprep.mubr.msk.bf16.mxu1 %vm2620_vm1, %v2619_v0 }
 0xb62   :  { %2253 = vmatpush3.bf16.msra.mxu0 %v2760_v22  ;;  %2260 = vmatprep.subr.bf16.mxu1 %v2619_v0 }
 0xb63   :  { %2266 = vmatprep.subr.bf16.mxu0 %v2619_v0 }
 0xb65   :  { %2255 = vmatmul.mubr.msk.bf16.vlgmr.msra.gmra.mrb[32].mxu0 %vm79_vm0, %v1058_v16  ;;  %2261 = vmatpush3.bf16.msra.mxu1 %v2731_v9 }
 0xb66   :  { %2267 = vmatpush3.bf16.msra.mxu0 %v2738_v11  ;;  %2274 = vmatprep.subr.bf16.mxu1 %v2619_v0 }
 0xb67   :  { %2268 = vmatprep.subr.bf16.mxu0 %v2619_v0  ;;  %2270 = vmatprep.mubr.msk.bf16.mxu0 %vm2620_vm1, %v2619_v0 }
 0xb6a   :  { %2269 = vmatpush3.bf16.msra.mxu0 %v2752_v19 }
 0xb6b   :  { %2282 = vmatprep.subr.bf16.mxu0 %v2619_v0 }
 0xc2f   :  { %v1050_v15 = vpop.f32.mrb[28].mxu0 }
 0xc30   :  { %v2240_v17 = vpop.f32.mrb[29].mxu0 }
 0xc31   :  { %v1053_v21 = vpop.f32.mrb[30].mxu0 }
 0xc32   :  { %v2241_v24 = vpop.f32.mrb[31].mxu0 }
 0xc33   :  { %v1096_v20 = vpop.f32.mrb[28].mxu1 }
 0xc34   :  { %v1097_v18 = vadd.f32 %v1096_v20, %v1050_v15  ;;  %v2248_v25 = vpop.f32.mrb[29].mxu1 }
 0xc35   :  { %v1099_v26 = vpop.f32.mrb[30].mxu1 }
 0xc36   :  { %v1102_v28 = vadd.f32 %v2806_v44, %v1097_v18  ;;  %v2249_v29 = vpop.f32.mrb[31].mxu1 }
 0xc38   :  { %2439 = vtanh.f32 %v1102_v28  ;;  %v1163_v31 = vpop.f32.mrb[32].mxu0  ;;  %v2017_v39 = vmul.f32 -1.442695, %v1102_v28 }
 0xc39   :  { %v1169_v23 = vadd.f32 %v1163_v31, %v2799_v40  ;;  %v2256_v32 = vpop.f32.mrb[33].mxu0 }
 0xc3a   :  { %v1166_v34 = vpop.f32.mrb[34].mxu0 }
 0xc3b   :  { %2441 = vtanh.f32 %v1169_v23  ;;  %v2257_v35 = vpop.f32.mrb[35].mxu0  ;;  %v2019_v41 = vmul.f32 -1.442695, %v1169_v23 }
 0xc3c   :  { %2443 = vpow2.f32 %v2017_v39 }
 0xc3d   :  { %2445 = vpow2.f32 %v2019_v41 }
 0xc42   :  { %v2440_v36 = vpop.eup %2439 }
 0xc43   :  { %1112 = vrot.lane.b32.xlu0 %v2440_v36, %s2621_s10 }
 0xc45   :  { %v2442_v37 = vpop.eup %2441 }
 0xc46   :  { %1179 = vrot.lane.b32.xlu1 %v2442_v37, %s2621_s10  ;;  %v2444_v43 = vpop.eup %2443 }
 0xc47   :  { %v2446_v45 = vpop.eup %2445  ;;  %v1106_v47 = vadd.f32 1.0, %v2444_v43 }
 0xc48   :  { %v1173_v48 = vadd.f32 1.0, %v2446_v45 }
 0xc49   :  { %2447 = vrcp.f32 %v1106_v47 }
 0xc4a   :  { %2449 = vrcp.f32 %v1173_v48 }
 0xc53   :  { %v2448_v40 = vpop.eup %2447 }
 0xc54   :  { %v2450_v51 = vpop.eup %2449  ;;  %v1110_v54 = vmul.f32 %v2448_v40, %v2932_v62 }
 0xc55   :  { %v1177_v56 = vmul.f32 %v2450_v51, %v2936_v3 }
 0xcb5   :  { %v1113_v49 = vpop.permute.xlu0 %1112 }
 0xcb6   :  { %v1115_v50 = vmul.f32 %v2448_v40, %v1113_v49 }
 0xcb8   :  { %v1180_v52 = vpop.permute.xlu1 %1179  ;;  %1117 = vrot.lane.b32.xlu0 %v1115_v50, %s2621_s10 }
 0xcb9   :  { %v1182_v53 = vmul.f32 %v2450_v51, %v1180_v52 }
 0xcbb   :  { %1184 = vrot.lane.b32.xlu1 %v1182_v53, %s2621_s10 }
 0xd2a   :  { %v1118_v55 = vpop.permute.xlu0 %1117 }
 0xd2b   :  { %v2971_v30 = vadd.f32 %v1118_v55, %v1110_v54  ;;  %v3025_v54 = vld [vmem:[%s3166_s2] sm:$0xff]  }
 0xd2d   :  { %2451 = vtanh.f32 %v2971_v30  ;;  %v1185_v57 = vpop.permute.xlu1 %1184 }
 0xd2e   :  { %v2975_v58 = vadd.f32 %v1185_v57, %v1177_v56  ;;  %v3040_v56 = vld [vmem:[%s3166_s2 + $0x8] sm:$0xff]   ;;  %v3046_v57 = vld [vmem:[#allocation12 + $0x8] sm:$0xff]  }
 0xd30   :  { %2453 = vtanh.f32 %v2975_v58 }
 0xd37   :  { %v2452_v59 = vpop.eup %2451 }
 0xd38   :  { %1123 = vrot.lane.b32.xlu0 %v2452_v59, %s2621_s10  ;;  %v3062_v59 = vld [vmem:[%s3168_s4 + $0x8] sm:$0xff]  }
 0xd3a   :  { %v2454_v60 = vpop.eup %2453 }
 0xd3b   :  { %1190 = vrot.lane.b32.xlu1 %v2454_v60, %s2621_s10 }
 0xdaa   :  { %v1124_v61 = vpop.permute.xlu0 %1123 }
 0xdab   :  { %v1126_v27 = vmul.f32 %v2448_v40, %v1124_v61 }
 0xdad   :  { %v1195_v62 = vpack.c.bf16 %v1126_v27, %v1126_v27  ;;  %v1191_v63 = vpop.permute.xlu1 %1190 }
 0xdae   :  { %v1193_v1 = vmul.f32 %v2450_v51, %v1191_v63 }
 0xdaf   :  { %1197 = vrot.lane.b32.xlu0 %v1195_v62, %s2613_s19 }
 0xdb0   :  { %v1194_v3 = vpack.c.bf16 %v1193_v1, %v1193_v1 }
 0xdb2   :  { %1243 = vrot.lane.b32.xlu1 %v1194_v3, %s2613_s19 }
 0xe21   :  { %v1198_v33 = vpop.permute.xlu0 %1197 }
 0xe22   :  { %2263 = vmatmul.mubr.msk.bf16.vlgmr.msra.gmra.mrb[32].mxu1 %vm79_vm0, %v1198_v33 }
 0xe23   :  { %2275 = vmatpush3.bf16.msra.mxu1 %v2744_v13  ;;  %2278 = vmatprep.mubr.msk.bf16.mxu1 %vm2620_vm1, %v2619_v0 }
 0xe24   :  { %v1244_v4 = vpop.permute.xlu1 %1243  ;;  %2276 = vmatprep.subr.bf16.mxu1 %v2619_v0 }
 0xe25   :  { %2271 = vmatmul.mubr.msk.bf16.vlgmr.msra.gmra.mrb[36].mxu0 %vm79_vm0, %v1244_v4 }
 0xe26   :  { %2283 = vmatpush3.bf16.msra.mxu0 %v2727_v2  ;;  %2286 = vmatprep.mubr.msk.bf16.mxu0 %vm2620_vm1, %v2619_v0 }
 0xe27   :  { %2277 = vmatpush3.bf16.msra.mxu1 %v2760_v22  ;;  %2284 = vmatprep.subr.bf16.mxu0 %v2619_v0 }
 0xe28   :  { %2290 = vmatprep.subr.bf16.mxu1 %v2619_v0 }
 0xe2a   :  { %2279 = vmatmul.mubr.msk.bf16.vlgmr.msra.gmra.mrb[36].mxu1 %vm79_vm0, %v1244_v4  ;;  %2285 = vmatpush3.bf16.msra.mxu0 %v2731_v9 }
 0xe2b   :  { %2291 = vmatpush3.bf16.msra.mxu1 %v2738_v11  ;;  %2298 = vmatprep.subr.bf16.mxu0 %v2619_v0 }
 0xe2c   :  { %2292 = vmatprep.subr.bf16.mxu1 %v2619_v0  ;;  %2294 = vmatprep.mubr.msk.bf16.mxu1 %vm2620_vm1, %v2619_v0 }
 0xe2f   :  { %2293 = vmatpush3.bf16.msra.mxu1 %v2752_v19 }
 0xe30   :  { %2306 = vmatprep.subr.bf16.mxu1 %v2619_v0 }
 0xef5   :  { %v1236_v2 = vpop.f32.mrb[32].mxu1 }
 0xef6   :  { %v2264_v13 = vpop.f32.mrb[33].mxu1 }
 0xef7   :  { %v1239_v22 = vpop.f32.mrb[34].mxu1 }
 0xef8   :  { %v1282_v5 = vpop.f32.mrb[36].mxu0  ;;  %v2265_v6 = vpop.f32.mrb[35].mxu1 }
 0xef9   :  { %v1283_v7 = vadd.f32 %v1282_v5, %v1236_v2  ;;  %v2272_v9 = vpop.f32.mrb[37].mxu0 }
 0xefa   :  { %v1285_v8 = vpop.f32.mrb[38].mxu0 }
 0xefb   :  { %v1288_v11 = vadd.f32 %v2806_v44, %v1283_v7  ;;  %v2273_v12 = vpop.f32.mrb[39].mxu0 }
 0xefd   :  { %2455 = vtanh.f32 %v1288_v11  ;;  %v1349_v10 = vpop.f32.mrb[36].mxu1  ;;  %v2022_v24 = vmul.f32 -1.442695, %v1288_v11 }
 0xefe   :  { %v1355_v14 = vadd.f32 %v1349_v10, %v2808_v46  ;;  %v2280_v16 = vpop.f32.mrb[37].mxu1 }
 0xeff   :  { %v1352_v15 = vpop.f32.mrb[38].mxu1 }
 0xf00   :  { %2457 = vtanh.f32 %v1355_v14  ;;  %v2281_v19 = vpop.f32.mrb[39].mxu1  ;;  %v2024_v20 = vmul.f32 -1.442695, %v1355_v14 }
 0xf01   :  { %2459 = vpow2.f32 %v2022_v24 }
 0xf02   :  { %2461 = vpow2.f32 %v2024_v20 }
 0xf07   :  { %v2456_v17 = vpop.eup %2455 }
 0xf08   :  { %1298 = vrot.lane.b32.xlu0 %v2456_v17, %s2621_s10 }
 0xf0a   :  { %v2458_v21 = vpop.eup %2457 }
 0xf0b   :  { %1365 = vrot.lane.b32.xlu1 %v2458_v21, %s2621_s10  ;;  %v2460_v18 = vpop.eup %2459 }
 0xf0c   :  { %v2462_v25 = vpop.eup %2461  ;;  %v1292_v26 = vadd.f32 1.0, %v2460_v18 }
 0xf0d   :  { %v1359_v28 = vadd.f32 1.0, %v2462_v25 }
 0xf0e   :  { %2463 = vrcp.f32 %v1292_v26 }
 0xf0f   :  { %2465 = vrcp.f32 %v1359_v28 }
 0xf18   :  { %v2464_v46 = vpop.eup %2463 }
 0xf19   :  { %v2466_v23 = vpop.eup %2465  ;;  %v1296_v35 = vmul.f32 %v2464_v46, %v2971_v30  ;;  %v3032_v30 = vld [vmem:[#allocation12] sm:$0xff]  }
 0xf1a   :  { %v1363_v39 = vmul.f32 %v2466_v23, %v2975_v58  ;;  %v3052_v58 = vld [vmem:[%s3168_s4] sm:$0xff]  }
 0xf7a   :  { %v1299_v29 = vpop.permute.xlu0 %1298 }
 0xf7b   :  { %v1301_v31 = vmul.f32 %v2464_v46, %v1299_v29 }
 0xf7d   :  { %1303 = vrot.lane.b32.xlu0 %v1301_v31, %s2621_s10  ;;  %v1366_v32 = vpop.permute.xlu1 %1365 }
 0xf7e   :  { %v1368_v34 = vmul.f32 %v2466_v23, %v1366_v32 }
 0xf80   :  { %1370 = vrot.lane.b32.xlu1 %v1368_v34, %s2621_s10 }
 0xfef   :  { %v1304_v36 = vpop.permute.xlu0 %1303 }
 0xff0   :  { %v3010_v37 = vadd.f32 %v1304_v36, %v1296_v35 }
 0xff2   :  { %2467 = vtanh.f32 %v3010_v37  ;;  %v1371_v41 = vpop.permute.xlu1 %1370 }
 0xff3   :  { %v3014_v43 = vadd.f32 %v1371_v41, %v1363_v39 }
 0xff5   :  { %2469 = vtanh.f32 %v3014_v43 }
 0xffc   :  { %v2468_v45 = vpop.eup %2467 }
 0xffd   :  { %1309 = vrot.lane.b32.xlu0 %v2468_v45, %s2621_s10 }
 0xfff   :  { %v2470_v47 = vpop.eup %2469 }
0x1000   :  { %1376 = vrot.lane.b32.xlu1 %v2470_v47, %s2621_s10 }
0x106f   :  { %v1310_v48 = vpop.permute.xlu0 %1309 }
0x1070   :  { %v1312_v40 = vmul.f32 %v2464_v46, %v1310_v48 }
0x1072   :  { %v1381_v49 = vpack.c.bf16 %v1312_v40, %v1312_v40  ;;  %v1377_v50 = vpop.permute.xlu1 %1376 }
0x1073   :  { %v1379_v51 = vmul.f32 %v2466_v23, %v1377_v50 }
0x1074   :  { %1383 = vrot.lane.b32.xlu0 %v1381_v49, %s2613_s19 }
0x1075   :  { %v1380_v52 = vpack.c.bf16 %v1379_v51, %v1379_v51 }
0x1077   :  { %1429 = vrot.lane.b32.xlu1 %v1380_v52, %s2613_s19  ;;  %v3107_v52 = vld [vmem:[%s3170_s6] ss:$0 sm:$0xff] }
0x10e6   :  { %v1384_v53 = vpop.permute.xlu0 %1383 }
0x10e7   :  { %2287 = vmatmul.mubr.msk.bf16.vlgmr.msra.gmra.mrb[40].mxu0 %vm79_vm0, %v1384_v53 }
0x10e8   :  { %2299 = vmatpush3.bf16.msra.mxu0 %v3025_v54  ;;  %2302 = vmatprep.mubr.msk.bf16.mxu0 %vm2620_vm1, %v2619_v0 }
0x10e9   :  { %v1430_v55 = vpop.permute.xlu1 %1429  ;;  %2300 = vmatprep.subr.bf16.mxu0 %v2619_v0 }
0x10ea   :  { %2295 = vmatmul.mubr.msk.bf16.vlgmr.msra.gmra.mrb[40].mxu1 %vm79_vm0, %v1430_v55 }
0x10eb   :  { %2307 = vmatpush3.bf16.msra.mxu1 %v3032_v30  ;;  %2310 = vmatprep.mubr.msk.bf16.mxu1 %vm2620_vm1, %v2619_v0 }
0x10ec   :  { %2301 = vmatpush3.bf16.msra.mxu0 %v3040_v56  ;;  %2308 = vmatprep.subr.bf16.mxu1 %v2619_v0 }
0x10ed   :  { %2314 = vmatprep.subr.bf16.mxu0 %v2619_v0 }
0x10ef   :  { %2303 = vmatmul.mubr.msk.bf16.vlgmr.msra.gmra.mrb[44].mxu0 %vm79_vm0, %v1430_v55  ;;  %2309 = vmatpush3.bf16.msra.mxu1 %v3046_v57 }
0x10f0   :  { %2315 = vmatpush3.bf16.msra.mxu0 %v3052_v58  ;;  %2322 = vmatprep.subr.bf16.mxu1 %v2619_v0 }
0x10f1   :  { %2316 = vmatprep.subr.bf16.mxu0 %v2619_v0  ;;  %2318 = vmatprep.mubr.msk.bf16.mxu0 %vm2620_vm1, %v2619_v0 }
0x10f4   :  { %2317 = vmatpush3.bf16.msra.mxu0 %v3062_v59 }
0x10f5   :  { %2330 = vmatprep.subr.bf16.mxu0 %v2619_v0 }
0x11ba   :  { %v1422_v60 = vpop.f32.mrb[40].mxu0 }
0x11bb   :  { %v2288_v61 = vpop.f32.mrb[41].mxu0 }
0x11bc   :  { %v1425_v27 = vpop.f32.mrb[42].mxu0 }
0x11bd   :  { %v2289_v62 = vpop.f32.mrb[43].mxu0  ;;  %v1468_v63 = vpop.f32.mrb[40].mxu1 }
0x11be   :  { %v1469_v1 = vadd.f32 %v1468_v63, %v1422_v60  ;;  %v2296_v3 = vpop.f32.mrb[41].mxu1 }
0x11bf   :  { %v1471_v33 = vpop.f32.mrb[42].mxu1 }
0x11c0   :  { %v1474_v4 = vadd.f32 %v2806_v44, %v1469_v1  ;;  %v2297_v2 = vpop.f32.mrb[43].mxu1 }
0x11c2   :  { %2471 = vtanh.f32 %v1474_v4  ;;  %v1535_v13 = vpop.f32.mrb[44].mxu0  ;;  %v2027_v11 = vmul.f32 -1.442695, %v1474_v4 }
0x11c3   :  { %v1541_v22 = vadd.f32 %v1535_v13, %v2797_v38  ;;  %v2304_v5 = vpop.f32.mrb[45].mxu0 }
0x11c4   :  { %v1538_v6 = vpop.f32.mrb[46].mxu0 }
0x11c5   :  { %2473 = vtanh.f32 %v1541_v22  ;;  %v2305_v7 = vpop.f32.mrb[47].mxu0  ;;  %v2029_v12 = vmul.f32 -1.442695, %v1541_v22 }
0x11c6   :  { %2475 = vpow2.f32 %v2027_v11 }
0x11c7   :  { %2477 = vpow2.f32 %v2029_v12 }
0x11cc   :  { %v2472_v9 = vpop.eup %2471 }
0x11cd   :  { %1484 = vrot.lane.b32.xlu0 %v2472_v9, %s2621_s10 }
0x11cf   :  { %v2474_v8 = vpop.eup %2473 }
0x11d0   :  { %1551 = vrot.lane.b32.xlu1 %v2474_v8, %s2621_s10  ;;  %v2476_v44 = vpop.eup %2475 }
0x11d1   :  { %v2478_v10 = vpop.eup %2477  ;;  %v1478_v14 = vadd.f32 1.0, %v2476_v44 }
0x11d2   :  { %v1545_v16 = vadd.f32 1.0, %v2478_v10 }
0x11d3   :  { %2479 = vrcp.f32 %v1478_v14 }
0x11d4   :  { %2481 = vrcp.f32 %v1545_v16 }
0x11dd   :  { %v2480_v38 = vpop.eup %2479 }
0x11de   :  { %v2482_v17 = vpop.eup %2481  ;;  %v1482_v20 = vmul.f32 %v2480_v38, %v3010_v37 }
0x11df   :  { %v1549_v26 = vmul.f32 %v2482_v17, %v3014_v43 }
0x123f   :  { %v1485_v15 = vpop.permute.xlu0 %1484 }
0x1240   :  { %v1487_v19 = vmul.f32 %v2480_v38, %v1485_v15 }
0x1242   :  { %v1552_v21 = vpop.permute.xlu1 %1551  ;;  %1489 = vrot.lane.b32.xlu0 %v1487_v19, %s2621_s10 }
0x1243   :  { %v1554_v24 = vmul.f32 %v2482_v17, %v1552_v21 }
0x1245   :  { %1556 = vrot.lane.b32.xlu1 %v1554_v24, %s2621_s10 }
0x12b4   :  { %v1490_v18 = vpop.permute.xlu0 %1489 }
0x12b5   :  { %v3073_v25 = vadd.f32 %v1490_v18, %v1482_v20 }
0x12b7   :  { %2483 = vtanh.f32 %v3073_v25  ;;  %v1557_v28 = vpop.permute.xlu1 %1556 }
0x12b8   :  { %v3077_v46 = vadd.f32 %v1557_v28, %v1549_v26 }
0x12ba   :  { %2485 = vtanh.f32 %v3077_v46 }
0x12c1   :  { %v2484_v29 = vpop.eup %2483 }
0x12c2   :  { %1495 = vrot.lane.b32.xlu0 %v2484_v29, %s2621_s10 }
0x12c4   :  { %v2486_v31 = vpop.eup %2485 }
0x12c5   :  { %1562 = vrot.lane.b32.xlu1 %v2486_v31, %s2621_s10 }
0x1334   :  { %v1496_v23 = vpop.permute.xlu0 %1495 }
0x1335   :  { %v1498_v32 = vmul.f32 %v2480_v38, %v1496_v23 }
0x1337   :  { %v1567_v34 = vpack.c.bf16 %v1498_v32, %v1498_v32  ;;  %v1563_v35 = vpop.permute.xlu1 %1562 }
0x1338   :  { %v1565_v36 = vmul.f32 %v2482_v17, %v1563_v35 }
0x1339   :  { %1569 = vrot.lane.b32.xlu0 %v1567_v34, %s2613_s19 }
0x133a   :  { %v1566_v37 = vpack.c.bf16 %v1565_v36, %v1565_v36 }
0x133c   :  { %1615 = vrot.lane.b32.xlu1 %v1566_v37, %s2613_s19 }
0x13ab   :  { %v1570_v39 = vpop.permute.xlu0 %1569 }
0x13ac   :  { %2311 = vmatmul.mubr.msk.bf16.vlgmr.msra.gmra.mrb[44].mxu1 %vm79_vm0, %v1570_v39 }
0x13ad   :  { %2323 = vmatpush3.bf16.msra.mxu1 %v3025_v54  ;;  %2326 = vmatprep.mubr.msk.bf16.mxu1 %vm2620_vm1, %v2619_v0 }
0x13ae   :  { %v1616_v41 = vpop.permute.xlu1 %1615  ;;  %2324 = vmatprep.subr.bf16.mxu1 %v2619_v0 }
0x13af   :  { %2319 = vmatmul.mubr.msk.bf16.vlgmr.msra.gmra.mrb[48].mxu0 %vm79_vm0, %v1616_v41 }
0x13b0   :  { %2331 = vmatpush3.bf16.msra.mxu0 %v3032_v30  ;;  %2334 = vmatprep.mubr.msk.bf16.mxu0 %vm2620_vm1, %v2619_v0 }
0x13b1   :  { %2325 = vmatpush3.bf16.msra.mxu1 %v3040_v56  ;;  %2332 = vmatprep.subr.bf16.mxu0 %v2619_v0 }
0x13b2   :  { %2338 = vmatprep.subr.bf16.mxu1 %v2619_v0 }
0x13b4   :  { %2327 = vmatmul.mubr.msk.bf16.vlgmr.msra.gmra.mrb[48].mxu1 %vm79_vm0, %v1616_v41  ;;  %2333 = vmatpush3.bf16.msra.mxu0 %v3046_v57 }
0x13b5   :  { %2339 = vmatpush3.bf16.msra.mxu1 %v3052_v58  ;;  %2342 = vmatprep.mubr.msk.bf16.mxu1 %vm2620_vm1, %v2619_v0 }
0x13b6   :  { %2340 = vmatprep.subr.bf16.mxu1 %v2619_v0  ;;  %2346 = vmatprep.subr.bf16.mxu0 %v2619_v0 }
0x13b9   :  { %2341 = vmatpush3.bf16.msra.mxu1 %v3062_v59 }
0x147f   :  { %v1608_v43 = vpop.f32.mrb[44].mxu1 }
0x1480   :  { %v2312_v45 = vpop.f32.mrb[45].mxu1 }
0x1481   :  { %v1611_v47 = vpop.f32.mrb[46].mxu1 }
0x1482   :  { %v1654_v48 = vpop.f32.mrb[48].mxu0  ;;  %v2313_v40 = vpop.f32.mrb[47].mxu1 }
0x1483   :  { %v1655_v49 = vadd.f32 %v1654_v48, %v1608_v43  ;;  %v2320_v50 = vpop.f32.mrb[49].mxu0  ;;  %v2373_v40 = vld [vmem:[%s3171_s7] sm:$0xff]  }
0x1484   :  { %v1657_v51 = vpop.f32.mrb[50].mxu0 }
0x1485   :  { %v1660_v53 = vadd.f32 %v3107_v52, %v1655_v49  ;;  %v2321_v54 = vpop.f32.mrb[51].mxu0  ;;  %v2374_v49 = vld [vmem:[%s3171_s7 + $0x8] sm:$0xff]  }
0x1487   :  { %2487 = vtanh.f32 %v1660_v53  ;;  %v1721_v55 = vpop.f32.mrb[48].mxu1  ;;  %v2032_v61 = vmul.f32 -1.442695, %v1660_v53 }
0x1488   :  { %v1727_v30 = vadd.f32 %v1721_v55, %v2801_v42  ;;  %v2328_v56 = vpop.f32.mrb[49].mxu1 }
0x1489   :  { %v1724_v57 = vpop.f32.mrb[50].mxu1  ;;  %v2038_v56 = vld [vmem:[%s3172_s8] ss:$0 sm:$0xff] }
0x148a   :  { %2489 = vtanh.f32 %v1727_v30  ;;  %v2329_v58 = vpop.f32.mrb[51].mxu1  ;;  %v2034_v27 = vmul.f32 -1.442695, %v1727_v30 }
0x148b   :  { %2491 = vpow2.f32 %v2032_v61 }
0x148c   :  { %2493 = vpow2.f32 %v2034_v27 }
0x1491   :  { %v2488_v59 = vpop.eup %2487 }
0x1492   :  { %1670 = vrot.lane.b32.xlu0 %v2488_v59, %s2621_s10 }
0x1494   :  { %v2490_v60 = vpop.eup %2489 }
0x1495   :  { %1737 = vrot.lane.b32.xlu1 %v2490_v60, %s2621_s10  ;;  %v2492_v62 = vpop.eup %2491 }
0x1496   :  { %v2494_v63 = vpop.eup %2493  ;;  %v1664_v1 = vadd.f32 1.0, %v2492_v62 }
0x1497   :  { %v1731_v3 = vadd.f32 1.0, %v2494_v63 }
0x1498   :  { %2495 = vrcp.f32 %v1664_v1 }
0x1499   :  { %2497 = vrcp.f32 %v1731_v3 }
0x14a2   :  { %v2496_v42 = vpop.eup %2495 }
0x14a3   :  { %v2498_v2 = vpop.eup %2497  ;;  %v1668_v5 = vmul.f32 %v2496_v42, %v3073_v25 }
0x14a4   :  { %v1735_v9 = vmul.f32 %v2498_v2, %v3077_v46 }
0x1504   :  { %v1671_v33 = vpop.permute.xlu0 %1670 }
0x1505   :  { %v1673_v4 = vmul.f32 %v2496_v42, %v1671_v33 }
0x1507   :  { %1675 = vrot.lane.b32.xlu0 %v1673_v4, %s2621_s10  ;;  %v1738_v13 = vpop.permute.xlu1 %1737 }
0x1508   :  { %v1740_v22 = vmul.f32 %v2498_v2, %v1738_v13 }
0x150a   :  { %1742 = vrot.lane.b32.xlu1 %v1740_v22, %s2621_s10 }
0x1579   :  { %v1676_v6 = vpop.permute.xlu0 %1675 }
0x157a   :  { %v3116_v7 = vadd.f32 %v1676_v6, %v1668_v5 }
0x157c   :  { %2499 = vtanh.f32 %v3116_v7  ;;  %v1743_v8 = vpop.permute.xlu1 %1742 }
0x157d   :  { %v1745_v11 = vadd.f32 %v1743_v8, %v1735_v9 }
0x157f   :  { %2501 = vtanh.f32 %v1745_v11 }
0x1586   :  { %v2500_v12 = vpop.eup %2499 }
0x1587   :  { %1681 = vrot.lane.b32.xlu0 %v2500_v12, %s2621_s10 }
0x1589   :  { %v2502_v44 = vpop.eup %2501 }
0x158a   :  { %1748 = vrot.lane.b32.xlu1 %v2502_v44, %s2621_s10 }
0x15f9   :  { %v1682_v10 = vpop.permute.xlu0 %1681 }
0x15fa   :  { %v1684_v14 = vmul.f32 %v2496_v42, %v1682_v10 }
0x15fc   :  { %v1749_v16 = vpop.permute.xlu1 %1748  ;;  %v1776_v38 = vpack.c.bf16 %v1684_v14, %v1684_v14 }
0x15fd   :  { %v1751_v15 = vmul.f32 %v2498_v2, %v1749_v16 }
0x15fe   :  { %1778 = vrot.lane.b32.xlu0 %v1776_v38, %s2613_s19 }
0x15ff   :  { %v1775_v19 = vpack.c.bf16 %v1751_v15, %v1751_v15 }
0x1601   :  { %1824 = vrot.lane.b32.xlu1 %v1775_v19, %s2613_s19 }
0x1670   :  { %v1779_v17 = vpop.permute.xlu0 %1778 }
0x1671   :  { %2335 = vmatmul.mubr.msk.bf16.vlgmr.msra.gmra.mrb[52].mxu0 %vm79_vm0, %v1779_v17 }
0x1672   :  { %2350 = vmatprep.mubr.msk.bf16.mxu0 %vm2620_vm1, %v2619_v0  ;;  %2347 = vmatpush3.bf16.msra.mxu0 %v2373_v40 }
0x1673   :  { %v1825_v21 = vpop.permute.xlu1 %1824  ;;  %2348 = vmatprep.subr.bf16.mxu0 %v2619_v0 }
0x1674   :  { %2343 = vmatmul.mubr.msk.bf16.vlgmr.msra.gmra.mrb[52].mxu1 %vm79_vm0, %v1825_v21 }
0x1676   :  { %2349 = vmatpush3.bf16.msra.mxu0 %v2374_v49 }
0x1744   :  { %v1817_v24 = vpop.f32.mrb[52].mxu0 }
0x1745   :  { %v2336_v20 = vpop.f32.mrb[53].mxu0 }
0x1746   :  { %v1820_v18 = vpop.f32.mrb[54].mxu0 }
0x1747   :  { %v2337_v25 = vpop.f32.mrb[55].mxu0  ;;  %v1863_v26 = vpop.f32.mrb[52].mxu1 }
0x1748   :  { %v1864_v28 = vadd.f32 %v1863_v26, %v1817_v24  ;;  %v2344_v46 = vpop.f32.mrb[53].mxu1 }
0x1749   :  { %v1866_v29 = vpop.f32.mrb[54].mxu1 }
0x174a   :  { %v1869_v31 = vadd.f32 %v3107_v52, %v1864_v28  ;;  %v2345_v23 = vpop.f32.mrb[55].mxu1 }
0x174c   :  { %2503 = vtanh.f32 %v1869_v31  ;;  %v2037_v34 = vmul.f32 -1.442695, %v1869_v31 }
0x174e   :  { %2505 = vpow2.f32 %v2037_v34 }
0x1756   :  { %v2504_v32 = vpop.eup %2503 }
0x1757   :  { %1879 = vrot.lane.b32.xlu0 %v2504_v32, %s2621_s10 }
0x1758   :  { %v2506_v35 = vpop.eup %2505 }
0x1759   :  { %v1873_v36 = vadd.f32 1.0, %v2506_v35 }
0x175b   :  { %2507 = vrcp.f32 %v1873_v36 }
0x1765   :  { %v2508_v37 = vpop.eup %2507 }
0x1766   :  { %v1877_v43 = vmul.f32 %v2508_v37, %v3116_v7 }
0x17c9   :  { %v1880_v39 = vpop.permute.xlu0 %1879 }
0x17ca   :  { %v1882_v41 = vmul.f32 %v2508_v37, %v1880_v39 }
0x17cc   :  { %1884 = vrot.lane.b32.xlu1 %v1882_v41, %s2621_s10 }
0x183e   :  { %v1885_v45 = vpop.permute.xlu1 %1884 }
0x183f   :  { %v1887_v47 = vadd.f32 %v1885_v45, %v1877_v43 }
0x1841   :  { %2509 = vtanh.f32 %v1887_v47 }
0x184b   :  { %v2510_v48 = vpop.eup %2509 }
0x184c   :  { %1890 = vrot.lane.b32.xlu0 %v2510_v48, %s2621_s10 }
0x1850   :  { %1753 = vrot.lane.b32.xlu0 %v1751_v15, %s2613_s19 }
0x1854   :  { %1763 = vrot.lane.b32.xlu0 %v1684_v14, %s2613_s19 }
0x18be   :  { %v1891_v50 = vpop.permute.xlu0 %1890 }
0x18bf   :  { %v1893_v51 = vmul.f32 %v2508_v37, %v1891_v50 }
0x18c1   :  { %v1894_v52 = vpack.c.bf16 %v1893_v51, %v1893_v51 }
0x18c2   :  { %v1754_v53 = vpop.permute.xlu0 %1753 }
0x18c3   :  { %1756 = vst.msk [vmem:[#allocation3] sm:$0xff] %vm79_vm0, %v1754_v53  ;;  %1907 = vrot.lane.b32.xlu1 %v1894_v52, %s2613_s19  ;;  %s2623_s19 = smov [#allocation13]  }
0x18c4   :  { %s1972_s28 = sshll.u32 %s2623_s19, 4  ;;  %s1973_s28 = int_to_ptr.vmem [resolvable:$true] %s1972_s28 }
0x18c5   :  { %s2584_s29 = scalar_lea.vmem %s1973_s28, 128  ;;  %p2589_p11 = scmp.lt.s32.totalorder %s1973_s28, %s1973_s28 }
0x18c6   :  { %v1764_v54 = vpop.permute.xlu0 %1763  ;;  %p2585_p10 = scmp.ne.s32.totalorder %s1973_s28, %s2584_s29  ;;  %p2590_p12 = scmp.lt.s32.totalorder %s2584_s29, %s2584_s29 }
0x18c7   :  { %1766 = vst.msk [vmem:[#allocation5] sm:$0xff] %vm79_vm0, %v1764_v54  ;;  %1758 = vrot.lane.b32.xlu1 %v1745_v11, %s2622_s5 }
0x18c8   :  { %p2591_p13 = por %p2590_p12, %p2589_p11 }
0x18ca   :  { %p2592_p0 = pnand %p2591_p13, %p2585_p10 }
0x18cb   :  { %1768 = vrot.lane.b32.xlu1 %v3116_v7, %s2622_s5 }
0x1935   :  { %v1908_v0 = vpop.permute.xlu1 %1907 }
0x1936   :  { %2351 = vmatmul.mubr.msk.bf16.vlgmr.msra.gmra.mrb[56].mxu0 %vm79_vm0, %v1908_v0 }
0x1939   :  { %v1759_v55 = vpop.permute.xlu1 %1758 }
0x193a   :  { %1761 = vst.msk [vmem:[#allocation4] sm:$0xff] %vm79_vm0, %v1759_v55 }
0x193d   :  { %v1769_v30 = vpop.permute.xlu1 %1768 }
0x193e   :  { %1771 = vst.msk [vmem:[#allocation6] sm:$0xff] %vm79_vm0, %v1769_v30 }
0x1a09   :  { %v1958_v57 = vpop.f32.mrb[56].mxu0 }
0x1a0a   :  { %v1959_v58 = vadd.f32 %v2038_v56, %v1958_v57  ;;  %v2352_v59 = vpop.f32.mrb[57].mxu0 }
0x1a0b   :  { %v1961_v60 = vpop.f32.mrb[58].mxu0 }
0x1a0c   :  { %v2353_v61 = vpop.f32.mrb[59].mxu0  ;;  %1965 = vst.msk [vmem:[#allocation13] sm:$0xff] %vm1964_vm3, %v1959_v58 }
0x1a0d   :  { %2595 = shalt.err (!%p2592_p0)
}
0x1a0e   :  { %s2596_s8 = scalar_lea.hbm %s3173_s9, 128 }
0x1a0f   :  { %p2597_p1 = scmp.ne.s32.totalorder %s3173_s9, %s2596_s8  ;;  %p2600_p2 = scmp.lt.u32.totalorder %s2596_s8, %s3173_s9 }
0x1a11   :  { %p2602_p3 = pnand %p2600_p2, %p2597_p1 }
0x1a13   :  { %2605 = shalt.err (!%p2602_p3)
}
0x1a14   :  { %1975 = dma.vmem_to_hbm [thread:$0]  %s1973_s28, 128, %s3173_s9, [#allocation9]  }
0x1a15   :  { %2610 = dma.done.wait [#allocation9], 128  }
0x1a16   :  { %2611 = vsyncadd [#allocation9], 4294967168 }
0x1a17   :  { %1979 = vsyncpa [#allocation8], 1 }
0x1a18   :  { %1980 = vsyncpa [#allocation11], 1 }
0x1a19   :  { %1981 = vsyncpa [#allocation9], 1 }

</bundles_post_ra>
